<compile_context>
chip_gen: v6e
topology: v6e:2x2x1
jax: 0.10.0
libtpu: 0.0.40
codegen_flags: <defaults>
</compile_context>

<pallas_src>
import math
import functools

import jax
import jax.numpy as jnp
from jax.experimental import pallas as pl
from jax.experimental.pallas import tpu as pltpu


# ----------------------------------------------------------------------------
# Device-dependent tiling knobs
# ----------------------------------------------------------------------------

@functools.lru_cache(maxsize=None)
def _device_kind():
    try:
        return jax.devices()[0].device_kind.lower()
    except Exception:
        return ""


def _tm_target():
    # v7x has 64 MiB VMEM -> keep 512-row tiles; v5e/v6e have 128 MiB -> 1024.
    return 512 if "v7" in _device_kind() else 1024


@functools.lru_cache(maxsize=None)
def _vmem_limit():
    k = _device_kind()
    if "v7" in k:
        return 48 * 1024 * 1024
    if ("v4" in k) or ("v5" in k) or ("v6" in k):
        return 64 * 1024 * 1024
    return None


def _cparams(n_parallel):
    return pltpu.CompilerParams(
        dimension_semantics=("parallel",) * n_parallel,
        vmem_limit_bytes=_vmem_limit())


def _row_tiles(M):
    """Row tile + padded row count (pad-to-multiple instead of divisor search)."""
    target = _tm_target()
    if M <= target:
        return M, M                      # single full-extent block (exempt from 8|tm)
    tm = target
    Mp = ((M + tm - 1) // tm) * tm
    return tm, Mp


def _pad_rows(x, Mp):
    if x.shape[0] == Mp:
        return x
    pad = [(0, Mp - x.shape[0])] + [(0, 0)] * (x.ndim - 1)
    return jnp.pad(x, pad)


# ----------------------------------------------------------------------------
# In-kernel helpers (all math in f32)
# ----------------------------------------------------------------------------

def _erf_f32(x):
    # Abramowitz & Stegun 7.1.26 rational approximation, |err| < 1.5e-7.
    p = 0.3275911
    a1, a2, a3, a4, a5 = (0.254829592, -0.284496736, 1.421413741,
                          -1.453152027, 1.061405429)
    s = jnp.where(x >= 0.0, 1.0, -1.0)
    ax = jnp.abs(x)
    t = 1.0 / (1.0 + p * ax)
    poly = ((((a5 * t + a4) * t + a3) * t + a2) * t + a1) * t
    return s * (1.0 - poly * jnp.exp(-ax * ax))


def _gelu_exact(x):
    # PyTorch F.gelu default == exact erf GELU.
    return 0.5 * x * (1.0 + _erf_f32(x * 0.7071067811865476))


def _layernorm(z, gamma, beta):
    # PyTorch LayerNorm: biased variance, eps=1e-5, f32 statistics.
    mu = jnp.mean(z, axis=-1, keepdims=True)
    var = jnp.mean(jnp.square(z - mu), axis=-1, keepdims=True)
    return (z - mu) * jax.lax.rsqrt(var + 1e-5) * gamma + beta


# ----------------------------------------------------------------------------
# Pallas kernels
# ----------------------------------------------------------------------------

def _linear_kernel(a_ref, w_ref, b_ref, o_ref):
    # o = a @ w + b ; bf16 operands on the MXU, f32 accumulation.
    a = a_ref[...].astype(w_ref.dtype)
    o_ref[...] = (
        jnp.dot(a, w_ref[...], preferred_element_type=jnp.float32) + b_ref[...]
    ).astype(o_ref.dtype)


def _linear_gelu_kernel(a_ref, w_ref, b_ref, o_ref):
    # o = gelu(a @ w + b)  (FFN conv1 k=1 + activation fused; bf16 in / bf16 out)
    a = a_ref[...].astype(w_ref.dtype)
    z = jnp.dot(a, w_ref[...], preferred_element_type=jnp.float32) + b_ref[...]
    o_ref[...] = _gelu_exact(z).astype(o_ref.dtype)


def _linear_res_ln_kernel(a_ref, w_ref, b_ref, res_ref, g_ref, bt_ref, o_ref):
    # o = LayerNorm(res + (a @ w + b))  (matmul + residual + LN fused; bf16 stream)
    a = a_ref[...].astype(w_ref.dtype)
    y = jnp.dot(a, w_ref[...], preferred_element_type=jnp.float32) + b_ref[...]
    z = res_ref[...].astype(jnp.float32) + y
    o_ref[...] = _layernorm(z, g_ref[...], bt_ref[...]).astype(o_ref.dtype)


def _ln_gelu_mask_kernel(x_ref, g_ref, b_ref, m_ref, o_ref):
    # Encoder final LayerNorm + classification-head GELU + padding mask fused.
    h = _layernorm(x_ref[...].astype(jnp.float32), g_ref[...], b_ref[...])
    o_ref[...] = (_gelu_exact(h) * m_ref[...]).astype(o_ref.dtype)


def _embed_kernel(x_ref, w_ref, pe_ref, o_ref):
    # TokenEmbedding conv (im2col matmul, no bias) + positional embedding added
    # in-kernel; PE is broadcast over the batch grid axis (never tiled in HBM).
    x = x_ref[0].astype(w_ref.dtype)
    o_ref[0] = (
        jnp.dot(x, w_ref[...], preferred_element_type=jnp.float32) + pe_ref[...]
    ).astype(o_ref.dtype)


def _prob_metric_kernel(q_ref, kt_ref, cnt_ref, m_ref, *, inv_lk):
    # ProbSparse sparsity metric per (b, h):
    #   M[l] = max_s(Q[l].K[idx[l,s]]) - (1/L_K) * sum_s(Q[l].K[idx[l,s]])
    # computed as a full Q @ K^T MXU matmul + per-query sample-count mask
    # (duplicate samples weighted exactly) -- no gathered K_sample tensor.
    q = q_ref[0, 0]                       # (L, E) bf16
    kt = kt_ref[0, 0]                     # (E, L) bf16
    cnt = cnt_ref[...]                    # (L, L) f32 sample counts
    s = jnp.dot(q, kt, preferred_element_type=jnp.float32)          # (L, L)
    smax = jnp.max(jnp.where(cnt > 0.0, s, -jnp.inf), axis=-1, keepdims=True)
    ssum = jnp.sum(s * cnt, axis=-1, keepdims=True)
    m_ref[0, 0] = smax - ssum * inv_lk                               # (L, 1)


def _attn_core_kernel(q_ref, kt_ref, v_ref, o_ref, c_ref, *, scale):
    # Per-(batch, head) block:
    #   scores = Q_reduce @ K^T * scale ; attn = softmax(scores) ; o = attn @ V
    #   c      = mean(V, seq)   (ProbAttention initial context, emitted un-broadcast)
    q = q_ref[0, 0]                       # (u, E)  bf16
    kt = kt_ref[0, 0]                     # (E, L)  bf16 (pre-transposed, MXU-natural)
    v = v_ref[0, 0]                       # (L, E)  bf16
    s = jnp.dot(q, kt, preferred_element_type=jnp.float32) * scale   # (u, L) f32
    m = jnp.max(s, axis=-1, keepdims=True)
    e = jnp.exp(s - m)
    p = e * pl.reciprocal(jnp.sum(e, axis=-1, keepdims=True), approx=True)
    o_ref[0, 0] = jnp.dot(p.astype(jnp.bfloat16), v,
                          preferred_element_type=jnp.float32).astype(o_ref.dtype)
    c_ref[0, 0] = jnp.mean(v.astype(jnp.float32), axis=0,
                           keepdims=True).astype(c_ref.dtype)


# ----------------------------------------------------------------------------
# pallas_call wrappers (row-tiled, padded, lane-dense outputs)
# ----------------------------------------------------------------------------

def pallas_linear(a, w, b, out_dtype=jnp.bfloat16):
    M, K = a.shape
    _, N = w.shape
    tm, Mp = _row_tiles(M)
    out = pl.pallas_call(
        _linear_kernel,
        out_shape=jax.ShapeDtypeStruct((Mp, N), out_dtype),
        grid=(Mp // tm,),
        in_specs=[
            pl.BlockSpec((tm, K), lambda i: (i, 0)),
            pl.BlockSpec((K, N), lambda i: (0, 0)),
            pl.BlockSpec((1, N), lambda i: (0, 0)),
        ],
        out_specs=pl.BlockSpec((tm, N), lambda i: (i, 0)),
        compiler_params=_cparams(1),
    )(_pad_rows(a, Mp), w, b)
    return out[:M] if Mp != M else out


def pallas_linear_gelu(a, w, b):
    M, K = a.shape
    _, N = w.shape
    tm, Mp = _row_tiles(M)
    out = pl.pallas_call(
        _linear_gelu_kernel,
        out_shape=jax.ShapeDtypeStruct((Mp, N), jnp.bfloat16),
        grid=(Mp // tm,),
        in_specs=[
            pl.BlockSpec((tm, K), lambda i: (i, 0)),
            pl.BlockSpec((K, N), lambda i: (0, 0)),
            pl.BlockSpec((1, N), lambda i: (0, 0)),
        ],
        out_specs=pl.BlockSpec((tm, N), lambda i: (i, 0)),
        compiler_params=_cparams(1),
    )(_pad_rows(a, Mp), w, b)
    return out[:M] if Mp != M else out


def pallas_linear_res_ln(a, w, b, res, gamma, beta):
    M, K = a.shape
    _, N = w.shape
    tm, Mp = _row_tiles(M)
    out = pl.pallas_call(
        _linear_res_ln_kernel,
        out_shape=jax.ShapeDtypeStruct((Mp, N), jnp.bfloat16),
        grid=(Mp // tm,),
        in_specs=[
            pl.BlockSpec((tm, K), lambda i: (i, 0)),
            pl.BlockSpec((K, N), lambda i: (0, 0)),
            pl.BlockSpec((1, N), lambda i: (0, 0)),
            pl.BlockSpec((tm, N), lambda i: (i, 0)),
            pl.BlockSpec((1, N), lambda i: (0, 0)),
            pl.BlockSpec((1, N), lambda i: (0, 0)),
        ],
        out_specs=pl.BlockSpec((tm, N), lambda i: (i, 0)),
        compiler_params=_cparams(1),
    )(_pad_rows(a, Mp), w, b, _pad_rows(res, Mp), gamma, beta)
    return out[:M] if Mp != M else out


def pallas_ln_gelu_mask(x, gamma, beta, mask):
    M, N = x.shape
    tm, Mp = _row_tiles(M)
    out = pl.pallas_call(
        _ln_gelu_mask_kernel,
        out_shape=jax.ShapeDtypeStruct((Mp, N), jnp.bfloat16),
        grid=(Mp // tm,),
        in_specs=[
            pl.BlockSpec((tm, N), lambda i: (i, 0)),
            pl.BlockSpec((1, N), lambda i: (0, 0)),
            pl.BlockSpec((1, N), lambda i: (0, 0)),
            pl.BlockSpec((tm, 1), lambda i: (i, 0)),
        ],
        out_specs=pl.BlockSpec((tm, N), lambda i: (i, 0)),
        compiler_params=_cparams(1),
    )(_pad_rows(x, Mp), gamma, beta, _pad_rows(mask, Mp))
    return out[:M] if Mp != M else out


def pallas_embed(cols, w, pe):
    B, L, K = cols.shape
    _, N = w.shape
    tl = 512 if (L > 512 and L % 512 == 0) else L
    return pl.pallas_call(
        _embed_kernel,
        out_shape=jax.ShapeDtypeStruct((B, L, N), jnp.bfloat16),
        grid=(B, L // tl),
        in_specs=[
            pl.BlockSpec((1, tl, K), lambda b, l: (b, l, 0)),
            pl.BlockSpec((K, N), lambda b, l: (0, 0)),
            pl.BlockSpec((tl, N), lambda b, l: (l, 0)),
        ],
        out_specs=pl.BlockSpec((1, tl, N), lambda b, l: (b, l, 0)),
        compiler_params=_cparams(2),
    )(cols, w, pe)


def pallas_prob_metric(q, kt, cnt, l_k):
    B, H, L, E = q.shape
    kernel = functools.partial(_prob_metric_kernel, inv_lk=1.0 / float(l_k))
    m = pl.pallas_call(
        kernel,
        out_shape=jax.ShapeDtypeStruct((B, H, L, 1), jnp.float32),
        grid=(B, H),
        in_specs=[
            pl.BlockSpec((1, 1, L, E), lambda b, h: (b, h, 0, 0)),
            pl.BlockSpec((1, 1, E, L), lambda b, h: (b, h, 0, 0)),
            pl.BlockSpec((L, L), lambda b, h: (0, 0)),
        ],
        out_specs=pl.BlockSpec((1, 1, L, 1), lambda b, h: (b, h, 0, 0)),
        compiler_params=_cparams(2),
    )(q, kt, cnt)
    return m[..., 0]                                  # (B, H, L)


def pallas_prob_attn_core(q_red, kt, v):
    B, H, u, E = q_red.shape
    L = v.shape[2]
    scale = 1.0 / math.sqrt(E)
    kernel = functools.partial(_attn_core_kernel, scale=scale)
    return pl.pallas_call(
        kernel,
        out_shape=(
            jax.ShapeDtypeStruct((B, H, u, E), jnp.bfloat16),
            jax.ShapeDtypeStruct((B, H, 1, E), jnp.bfloat16),
        ),
        grid=(B, H),
        in_specs=[
            pl.BlockSpec((1, 1, u, E), lambda b, h: (b, h, 0, 0)),
            pl.BlockSpec((1, 1, E, L), lambda b, h: (b, h, 0, 0)),
            pl.BlockSpec((1, 1, L, E), lambda b, h: (b, h, 0, 0)),
        ],
        out_specs=(
            pl.BlockSpec((1, 1, u, E), lambda b, h: (b, h, 0, 0)),
            pl.BlockSpec((1, 1, 1, E), lambda b, h: (b, h, 0, 0)),
        ),
        compiler_params=_cparams(2),
    )(q_red, kt, v)


# ----------------------------------------------------------------------------
# Plain-JAX glue (sampling, selection, constants, reshapes)
# ----------------------------------------------------------------------------

def positional_embedding(L, d_model):
    position = jnp.arange(L, dtype=jnp.float32)[:, None]
    div_term = jnp.exp(
        jnp.arange(0, d_model, 2, dtype=jnp.float32) * -(math.log(10000.0) / d_model)
    )
    pe = jnp.zeros((L, d_model), jnp.float32)
    pe = pe.at[:, 0::2].set(jnp.sin(position * div_term))
    pe = pe.at[:, 1::2].set(jnp.cos(position * div_term))
    return pe


def prob_attention(q, k, v, factor, sample_key):
    """ProbSparse self-attention (mask_flag=False).

    q, k, v: (B, L, H, E) bf16.  Returns the attention layer context as
    (B*L, H*E) bf16, ready for the fused out-projection + residual + LN kernel.
    """
    B, L, H, E = q.shape
    L_K = L_Q = L

    U_part = min(int(factor * math.ceil(math.log(L_K))), L_K)
    u = min(int(factor * math.ceil(math.log(L_Q))), L_Q)

    q_bhle = jnp.transpose(q, (0, 2, 1, 3))       # (B,H,L,E)
    kt = jnp.transpose(k, (0, 2, 3, 1))           # (B,H,E,L)  MXU-natural RHS
    v_bhle = jnp.transpose(v, (0, 2, 1, 3))       # (B,H,L,E)

    # Random key sample shared across (b, h), exactly as torch.randint in the ref.
    index_sample = jax.random.randint(sample_key, (L_Q, U_part), 0, L_K)
    # cnt[l, j] = #times key j was sampled for query l (duplicates weighted exactly).
    cnt = jnp.zeros((L_Q, L_K), jnp.float32).at[
        jnp.arange(L_Q)[:, None], index_sample].add(1.0)

    # Sparsity metric on the MXU, no (B,H,L,U_part,E) gather materialized.
    M = pallas_prob_metric(q_bhle, kt, cnt, L_K)                     # (B,H,L)
    # TODO(synk): top-k selection has no clean Pallas equivalent (sort); kept in XLA.
    M_top = jax.lax.top_k(M, u)[1]                                   # (B,H,u)

    Q_reduce = jnp.take_along_axis(
        q_bhle, jnp.broadcast_to(M_top[..., None], (B, H, u, E)), axis=2)

    # Hot path: scores / softmax / @V and the per-head mean-V context in Pallas.
    out_top, mean_ctx = pallas_prob_attn_core(Q_reduce, kt, v_bhle)

    # ProbAttention initial context = mean(V) broadcast over L, attended rows
    # scattered in.  Built directly in (B, L, H, E) -> no (0,2,1,3) full transpose.
    context = jnp.broadcast_to(
        jnp.transpose(mean_ctx, (0, 2, 1, 3)), (B, L, H, E))
    b_i = jnp.arange(B)[:, None, None]
    h_i = jnp.arange(H)[None, :, None]
    context = context.at[b_i, M_top, h_i].set(out_top)               # (B,L,H,E) bf16
    return context.reshape(B * L, H * E)


# ----------------------------------------------------------------------------
# Parameters (deterministic synthetic init; matmul weights stored in bf16)
# ----------------------------------------------------------------------------

def init_params(key, cfg):
    C, d_model, d_ff = cfg["enc_in"], cfg["d_model"], cfg["d_ff"]
    L, num_class = cfg["seq_len"], cfg["num_class"]

    keys = iter(jax.random.split(key, 2 + 4 * cfg["e_layers"]))

    def nrm(shape):
        return (jax.random.normal(next(keys), shape, jnp.float32) * 0.02).astype(
            jnp.bfloat16)

    params = {
        # TokenEmbedding Conv1d(C, d_model, k=3, circular, bias=False) flattened
        # as (3*C, d_model): row index = tap*C + in_channel.
        "emb_w": nrm((3 * C, d_model)),
        "layers": [],
        "lnf_g": jnp.ones((1, d_model), jnp.float32),
        "lnf_b": jnp.zeros((1, d_model), jnp.float32),
        "proj_w": nrm((d_model * L, num_class)),
        "proj_b": jnp.zeros((1, num_class), jnp.float32),
    }
    for _ in range(cfg["e_layers"]):
        params["layers"].append({
            # fused Q|K|V projection
            "wqkv": nrm((d_model, 3 * d_model)),
            "bqkv": jnp.zeros((1, 3 * d_model), jnp.float32),
            "wo": nrm((d_model, d_model)), "bo": jnp.zeros((1, d_model), jnp.float32),
            "ln1_g": jnp.ones((1, d_model), jnp.float32),
            "ln1_b": jnp.zeros((1, d_model), jnp.float32),
            "w1": nrm((d_model, d_ff)), "b1": jnp.zeros((1, d_ff), jnp.float32),
            "w2": nrm((d_ff, d_model)), "b2": jnp.zeros((1, d_model), jnp.float32),
            "ln2_g": jnp.ones((1, d_model), jnp.float32),
            "ln2_b": jnp.zeros((1, d_model), jnp.float32),
        })
    return params


# ----------------------------------------------------------------------------
# Informer forward (classification task)
# ----------------------------------------------------------------------------

def informer_forward(params, x_enc, x_mark_enc, cfg, sample_key):
    B, L, C = x_enc.shape
    d_model, H = cfg["d_model"], cfg["n_heads"]
    E = d_model // H

    # --- DataEmbedding: TokenEmbedding (circular conv1d k=3, no bias) + PE ---
    x_pad = jnp.concatenate([x_enc[:, -1:], x_enc, x_enc[:, :1]], axis=1)   # circular pad
    cols = jnp.concatenate(
        [x_pad[:, 0:L], x_pad[:, 1:L + 1], x_pad[:, 2:L + 2]], axis=-1
    )                                                                        # (B,L,3C) im2col
    pe = positional_embedding(L, d_model)                                    # (L,d_model)
    x = pallas_embed(cols, params["emb_w"], pe).reshape(B * L, d_model)      # bf16
    # dropout -> identity

    layer_keys = jax.random.split(sample_key, cfg["e_layers"])
    for li in range(cfg["e_layers"]):
        p = params["layers"][li]
        # AttentionLayer: fused QKV projection -> ProbAttention -> out-proj+res+LN
        qkv = pallas_linear(x, p["wqkv"], p["bqkv"]).reshape(B, L, 3, H, E)  # bf16
        ctx = prob_attention(qkv[:, :, 0], qkv[:, :, 1], qkv[:, :, 2],
                             cfg["factor"], layer_keys[li])                  # (B*L,d_model)
        # x = norm1(x + dropout(out_proj(ctx)))   -- fused
        x = pallas_linear_res_ln(ctx, p["wo"], p["bo"], x, p["ln1_g"], p["ln1_b"])
        # FFN: conv1(k=1)+GELU fused; conv2(k=1)+residual+LN fused
        y = pallas_linear_gelu(x, p["w1"], p["b1"])                          # bf16 acts
        x = pallas_linear_res_ln(y, p["w2"], p["b2"], x, p["ln2_g"], p["ln2_b"])

    # Encoder final LayerNorm + head GELU + (dropout=identity) + padding mask, fused
    out = pallas_ln_gelu_mask(x, params["lnf_g"], params["lnf_b"],
                              x_mark_enc.reshape(B * L, 1))
    out = out.reshape(B, L * d_model)
    # Classifier (N = num_class ~ 5): deliberately left to XLA — a Pallas call would
    # waste MXU lanes / masked stores / grid overhead for microseconds of work.
    logits = jnp.dot(out, params["proj_w"],
                     preferred_element_type=jnp.float32) + params["proj_b"]
    return logits


# ----------------------------------------------------------------------------
# Main
# ----------------------------------------------------------------------------

if __name__ == "__main__":
    cfg = dict(
        enc_in=4, d_model=32, n_heads=4, d_ff=64, e_layers=2,
        seq_len=8, num_class=5, factor=5,
    )
    key = jax.random.PRNGKey(0)
    k_param, k_x, k_sample = jax.random.split(key, 3)

    params = init_params(k_param, cfg)

    B = 2
    x_enc = jax.random.normal(k_x, (B, cfg["seq_len"], cfg["enc_in"]), jnp.float32)
    x_mark_enc = jnp.ones((B, cfg["seq_len"]), jnp.float32)  # padding mask (all valid)

    fwd = jax.jit(functools.partial(informer_forward, cfg=cfg))
    logits = fwd(params, x_enc, x_mark_enc, sample_key=k_sample)
    logits = jax.block_until_ready(logits)
    assert logits.shape == (B, cfg["num_class"])
    assert bool(jnp.all(jnp.isfinite(logits)))
    print("KERNEL_OK")
</pallas_src>

<mosaic_0001>
module attributes {stable_mosaic.version = 11 : i64} {
  func.func private @main(%arg0: i32) attributes {dimension_semantics = [#tpu.dimension_semantics<core_parallel>], iteration_bounds = array<i64: 2>, tpu.core_type = #tpu.core_type<sc_scalar_subcore>, window_params = []} {
    return
  }
}

module attributes {stable_mosaic.version = 11 : i64} {
  func.func private @main(%arg0: i32) attributes {dimension_semantics = [#tpu.dimension_semantics<core_parallel>], iteration_bounds = array<i64: 2>, tpu.core_type = #tpu.core_type<sc_scalar_subcore>, window_params = []} {
    return
  }
}

module attributes {stable_mosaic.version = 11 : i64} {
  func.func @_embed_kernel(%arg0: i32, %arg1: i32, %arg2: memref<1x8x12xf32, #tpu.memory_space<vmem>>, %arg3: memref<12x32xbf16, #tpu.memory_space<vmem>>, %arg4: memref<8x32xf32, #tpu.memory_space<vmem>>, %arg5: memref<1x8x32xbf16, #tpu.memory_space<vmem>>) attributes {dimension_semantics = [#tpu.dimension_semantics<parallel>, #tpu.dimension_semantics<parallel>], iteration_bounds = array<i64: 2, 1>, scalar_prefetch = 0 : i64, scratch_operands = 0 : i64, tpu.core_type = #tpu.core_type<tc>, window_params = [{transform_indices = @transform_0, window_bounds = array<i64: 1, 8, 12>}, {pipeline_mode = #tpu.pipeline_mode<synchronous>, transform_indices = @transform_1, window_bounds = array<i64: 12, 32>}, {transform_indices = @transform_2, window_bounds = array<i64: 8, 32>}, {transform_indices = @transform_3, window_bounds = array<i64: 1, 8, 32>}]} {
    %c0 = arith.constant 0 : index
    %c0_0 = arith.constant 0 : index
    %c0_1 = arith.constant 0 : index
    %0 = vector.load %arg2[%c0, %c0_0, %c0_1] : memref<1x8x12xf32, #tpu.memory_space<vmem>>, vector<1x8x12xf32>
    %1 = vector.shape_cast %0 : vector<1x8x12xf32> to vector<8x12xf32>
    %2 = arith.truncf %1 : vector<8x12xf32> to vector<8x12xbf16>
    %c0_2 = arith.constant 0 : index
    %c0_3 = arith.constant 0 : index
    %3 = vector.load %arg3[%c0_2, %c0_3] : memref<12x32xbf16, #tpu.memory_space<vmem>>, vector<12x32xbf16>
    %cst = arith.constant dense<0.000000e+00> : vector<8x32xf32>
    %4 = tpu.matmul %2, %3, %cst {dimension_numbers = #tpu.dot_dimension_numbers<[1], [0], [0], [1], [0, 0, 1, 1], [], []>} : vector<8x12xbf16>, vector<12x32xbf16>, vector<8x32xf32> -> vector<8x32xf32>
    %c0_4 = arith.constant 0 : index
    %c0_5 = arith.constant 0 : index
    %5 = vector.load %arg4[%c0_4, %c0_5] : memref<8x32xf32, #tpu.memory_space<vmem>>, vector<8x32xf32>
    %6 = arith.addf %4, %5 : vector<8x32xf32>
    %7 = arith.truncf %6 : vector<8x32xf32> to vector<8x32xbf16>
    %c0_6 = arith.constant 0 : index
    %c0_7 = arith.constant 0 : index
    %c0_8 = arith.constant 0 : index
    %8 = vector.load %arg5[%c0_6, %c0_7, %c0_8] : memref<1x8x32xbf16, #tpu.memory_space<vmem>>, vector<1x8x32xbf16>
    %9 = vector.shape_cast %8 : vector<1x8x32xbf16> to vector<8x32xbf16>
    %10 = vector.shape_cast %7 : vector<8x32xbf16> to vector<1x8x32xbf16>
    tpu.vector_store %arg5[%c0_6, %c0_7, %c0_8], %10 {strides = array<i32>} : memref<1x8x32xbf16, #tpu.memory_space<vmem>>, vector<1x8x32xbf16>,
    return
  }
  func.func @transform_0(%arg0: i32, %arg1: i32) -> (i32, i32, i32) {
    %c0_i32 = arith.constant 0 : i32
    %c0_i32_0 = arith.constant 0 : i32
    return %arg0, %arg1, %c0_i32 : i32, i32, i32
  }
  func.func @transform_1(%arg0: i32, %arg1: i32) -> (i32, i32) {
    %c0_i32 = arith.constant 0 : i32
    %c0_i32_0 = arith.constant 0 : i32
    %c0_i32_1 = arith.constant 0 : i32
    return %c0_i32, %c0_i32_0 : i32, i32
  }
  func.func @transform_2(%arg0: i32, %arg1: i32) -> (i32, i32) {
    %c0_i32 = arith.constant 0 : i32
    %c0_i32_0 = arith.constant 0 : i32
    return %arg1, %c0_i32 : i32, i32
  }
  func.func @transform_3(%arg0: i32, %arg1: i32) -> (i32, i32, i32) {
    %c0_i32 = arith.constant 0 : i32
    %c0_i32_0 = arith.constant 0 : i32
    return %arg0, %arg1, %c0_i32 : i32, i32, i32
  }
}

module attributes {stable_mosaic.version = 11 : i64} {
  func.func @_linear_kernel(%arg0: i32, %arg1: memref<16x32xbf16, #tpu.memory_space<vmem>>, %arg2: memref<32x96xbf16, #tpu.memory_space<vmem>>, %arg3: memref<1x96xf32, #tpu.memory_space<vmem>>, %arg4: memref<16x96xbf16, #tpu.memory_space<vmem>>) attributes {dimension_semantics = [#tpu.dimension_semantics<parallel>], iteration_bounds = array<i64: 1>, scalar_prefetch = 0 : i64, scratch_operands = 0 : i64, tpu.core_type = #tpu.core_type<tc>, window_params = [{transform_indices = @transform_0, window_bounds = array<i64: 16, 32>}, {pipeline_mode = #tpu.pipeline_mode<synchronous>, transform_indices = @transform_1, window_bounds = array<i64: 32, 96>}, {pipeline_mode = #tpu.pipeline_mode<synchronous>, transform_indices = @transform_2, window_bounds = array<i64: 1, 96>}, {transform_indices = @transform_3, window_bounds = array<i64: 16, 96>}]} {
    %c0 = arith.constant 0 : index
    %c0_0 = arith.constant 0 : index
    %0 = vector.load %arg1[%c0, %c0_0] : memref<16x32xbf16, #tpu.memory_space<vmem>>, vector<16x32xbf16>
    %c0_1 = arith.constant 0 : index
    %c0_2 = arith.constant 0 : index
    %1 = vector.load %arg2[%c0_1, %c0_2] : memref<32x96xbf16, #tpu.memory_space<vmem>>, vector<32x96xbf16>
    %cst = arith.constant dense<0.000000e+00> : vector<16x96xf32>
    %2 = tpu.matmul %0, %1, %cst {dimension_numbers = #tpu.dot_dimension_numbers<[1], [0], [0], [1], [0, 0, 1, 1], [], []>} : vector<16x32xbf16>, vector<32x96xbf16>, vector<16x96xf32> -> vector<16x96xf32>
    %c0_3 = arith.constant 0 : index
    %c0_4 = arith.constant 0 : index
    %3 = vector.load %arg3[%c0_3, %c0_4] : memref<1x96xf32, #tpu.memory_space<vmem>>, vector<1x96xf32>
    %4 = vector.broadcast %3 : vector<1x96xf32> to vector<16x96xf32>
    %5 = arith.addf %2, %4 : vector<16x96xf32>
    %6 = arith.truncf %5 : vector<16x96xf32> to vector<16x96xbf16>
    %c0_5 = arith.constant 0 : index
    %c0_6 = arith.constant 0 : index
    %7 = vector.load %arg4[%c0_5, %c0_6] : memref<16x96xbf16, #tpu.memory_space<vmem>>, vector<16x96xbf16>
    tpu.vector_store %arg4[%c0_5, %c0_6], %6 {strides = array<i32>} : memref<16x96xbf16, #tpu.memory_space<vmem>>, vector<16x96xbf16>,
    return
  }
  func.func @transform_0(%arg0: i32) -> (i32, i32) {
    %c0_i32 = arith.constant 0 : i32
    %c0_i32_0 = arith.constant 0 : i32
    return %arg0, %c0_i32 : i32, i32
  }
  func.func @transform_1(%arg0: i32) -> (i32, i32) {
    %c0_i32 = arith.constant 0 : i32
    %c0_i32_0 = arith.constant 0 : i32
    %c0_i32_1 = arith.constant 0 : i32
    return %c0_i32, %c0_i32_0 : i32, i32
  }
  func.func @transform_2(%arg0: i32) -> (i32, i32) {
    %c0_i32 = arith.constant 0 : i32
    %c0_i32_0 = arith.constant 0 : i32
    %c0_i32_1 = arith.constant 0 : i32
    return %c0_i32, %c0_i32_0 : i32, i32
  }
  func.func @transform_3(%arg0: i32) -> (i32, i32) {
    %c0_i32 = arith.constant 0 : i32
    %c0_i32_0 = arith.constant 0 : i32
    return %arg0, %c0_i32 : i32, i32
  }
}

module attributes {stable_mosaic.version = 11 : i64} {
  func.func @_prob_metric_kernel(%arg0: i32, %arg1: i32, %arg2: memref<1x1x8x8xbf16, #tpu.memory_space<vmem>>, %arg3: memref<1x1x8x8xbf16, #tpu.memory_space<vmem>>, %arg4: memref<8x8xf32, #tpu.memory_space<vmem>>, %arg5: memref<1x1x8x1xf32, #tpu.memory_space<vmem>>) attributes {dimension_semantics = [#tpu.dimension_semantics<parallel>, #tpu.dimension_semantics<parallel>], iteration_bounds = array<i64: 2, 4>, scalar_prefetch = 0 : i64, scratch_operands = 0 : i64, tpu.core_type = #tpu.core_type<tc>, window_params = [{transform_indices = @transform_0, window_bounds = array<i64: 1, 1, 8, 8>}, {transform_indices = @transform_1, window_bounds = array<i64: 1, 1, 8, 8>}, {pipeline_mode = #tpu.pipeline_mode<synchronous>, transform_indices = @transform_2, window_bounds = array<i64: 8, 8>}, {transform_indices = @transform_3, window_bounds = array<i64: 1, 1, 8, 1>}]} {
    %c0 = arith.constant 0 : index
    %c0_0 = arith.constant 0 : index
    %c0_1 = arith.constant 0 : index
    %c0_2 = arith.constant 0 : index
    %0 = vector.load %arg2[%c0, %c0_0, %c0_1, %c0_2] : memref<1x1x8x8xbf16, #tpu.memory_space<vmem>>, vector<1x1x8x8xbf16>
    %1 = vector.shape_cast %0 : vector<1x1x8x8xbf16> to vector<8x8xbf16>
    %c0_3 = arith.constant 0 : index
    %c0_4 = arith.constant 0 : index
    %c0_5 = arith.constant 0 : index
    %c0_6 = arith.constant 0 : index
    %2 = vector.load %arg3[%c0_3, %c0_4, %c0_5, %c0_6] : memref<1x1x8x8xbf16, #tpu.memory_space<vmem>>, vector<1x1x8x8xbf16>
    %3 = vector.shape_cast %2 : vector<1x1x8x8xbf16> to vector<8x8xbf16>
    %c0_7 = arith.constant 0 : index
    %c0_8 = arith.constant 0 : index
    %4 = vector.load %arg4[%c0_7, %c0_8] : memref<8x8xf32, #tpu.memory_space<vmem>>, vector<8x8xf32>
    %cst = arith.constant dense<0.000000e+00> : vector<8x8xf32>
    %5 = tpu.matmul %1, %3, %cst {dimension_numbers = #tpu.dot_dimension_numbers<[1], [0], [0], [1], [0, 0, 1, 1], [], []>} : vector<8x8xbf16>, vector<8x8xbf16>, vector<8x8xf32> -> vector<8x8xf32>
    %cst_9 = arith.constant 0.000000e+00 : f32
    %6 = vector.broadcast %cst_9 : f32 to vector<8x8xf32>
    %7 = arith.cmpf ogt, %4, %6 : vector<8x8xf32>
    %cst_10 = arith.constant 0xFF800000 : f32
    %8 = vector.broadcast %cst_10 : f32 to vector<8x8xf32>
    %9 = arith.select %7, %5, %8 : vector<8x8xi1>, vector<8x8xf32>
    %cst_11 = arith.constant dense<0xFF800000> : vector<8xf32>
    %10 = vector.multi_reduction <maximumf>, %9, %cst_11 [1] : vector<8x8xf32> to vector<8xf32>
    %11 = vector.shape_cast %10 : vector<8xf32> to vector<8x1xf32>
    %12 = arith.mulf %5, %4 : vector<8x8xf32>
    %cst_12 = arith.constant dense<0.000000e+00> : vector<8xf32>
    %13 = vector.multi_reduction <add>, %12, %cst_12 [1] : vector<8x8xf32> to vector<8xf32>
    %14 = vector.shape_cast %13 : vector<8xf32> to vector<8x1xf32>
    %cst_13 = arith.constant 1.250000e-01 : f32
    %15 = vector.broadcast %cst_13 : f32 to vector<8x1xf32>
    %16 = arith.mulf %14, %15 : vector<8x1xf32>
    %17 = arith.subf %11, %16 : vector<8x1xf32>
    %c0_14 = arith.constant 0 : index
    %c0_15 = arith.constant 0 : index
    %c0_16 = arith.constant 0 : index
    %c0_17 = arith.constant 0 : index
    %18 = vector.load %arg5[%c0_14, %c0_15, %c0_16, %c0_17] : memref<1x1x8x1xf32, #tpu.memory_space<vmem>>, vector<1x1x8x1xf32>
    %19 = vector.shape_cast %18 : vector<1x1x8x1xf32> to vector<8x1xf32>
    %20 = vector.shape_cast %17 : vector<8x1xf32> to vector<1x1x8x1xf32>
    tpu.vector_store %arg5[%c0_14, %c0_15, %c0_16, %c0_17], %20 {strides = array<i32>} : memref<1x1x8x1xf32, #tpu.memory_space<vmem>>, vector<1x1x8x1xf32>,
    return
  }
  func.func @transform_0(%arg0: i32, %arg1: i32) -> (i32, i32, i32, i32) {
    %c0_i32 = arith.constant 0 : i32
    %c0_i32_0 = arith.constant 0 : i32
    %c0_i32_1 = arith.constant 0 : i32
    return %arg0, %arg1, %c0_i32, %c0_i32_0 : i32, i32, i32, i32
  }
  func.func @transform_1(%arg0: i32, %arg1: i32) -> (i32, i32, i32, i32) {
    %c0_i32 = arith.constant 0 : i32
    %c0_i32_0 = arith.constant 0 : i32
    %c0_i32_1 = arith.constant 0 : i32
    return %arg0, %arg1, %c0_i32, %c0_i32_0 : i32, i32, i32, i32
  }
  func.func @transform_2(%arg0: i32, %arg1: i32) -> (i32, i32) {
    %c0_i32 = arith.constant 0 : i32
    %c0_i32_0 = arith.constant 0 : i32
    %c0_i32_1 = arith.constant 0 : i32
    return %c0_i32, %c0_i32_0 : i32, i32
  }
  func.func @transform_3(%arg0: i32, %arg1: i32) -> (i32, i32, i32, i32) {
    %c0_i32 = arith.constant 0 : i32
    %c0_i32_0 = arith.constant 0 : i32
    %c0_i32_1 = arith.constant 0 : i32
    return %arg0, %arg1, %c0_i32, %c0_i32_0 : i32, i32, i32, i32
  }
}

module attributes {stable_mosaic.version = 11 : i64} {
  func.func @_attn_core_kernel(%arg0: i32, %arg1: i32, %arg2: memref<1x1x8x8xbf16, #tpu.memory_space<vmem>>, %arg3: memref<1x1x8x8xbf16, #tpu.memory_space<vmem>>, %arg4: memref<1x1x8x8xbf16, #tpu.memory_space<vmem>>, %arg5: memref<1x1x8x8xbf16, #tpu.memory_space<vmem>>, %arg6: memref<1x1x1x8xbf16, #tpu.memory_space<vmem>>) attributes {dimension_semantics = [#tpu.dimension_semantics<parallel>, #tpu.dimension_semantics<parallel>], iteration_bounds = array<i64: 2, 4>, scalar_prefetch = 0 : i64, scratch_operands = 0 : i64, tpu.core_type = #tpu.core_type<tc>, window_params = [{transform_indices = @transform_0, window_bounds = array<i64: 1, 1, 8, 8>}, {transform_indices = @transform_1, window_bounds = array<i64: 1, 1, 8, 8>}, {transform_indices = @transform_2, window_bounds = array<i64: 1, 1, 8, 8>}, {transform_indices = @transform_3, window_bounds = array<i64: 1, 1, 8, 8>}, {transform_indices = @transform_4, window_bounds = array<i64: 1, 1, 1, 8>}]} {
    %c0 = arith.constant 0 : index
    %c0_0 = arith.constant 0 : index
    %c0_1 = arith.constant 0 : index
    %c0_2 = arith.constant 0 : index
    %0 = vector.load %arg2[%c0, %c0_0, %c0_1, %c0_2] : memref<1x1x8x8xbf16, #tpu.memory_space<vmem>>, vector<1x1x8x8xbf16>
    %1 = vector.shape_cast %0 : vector<1x1x8x8xbf16> to vector<8x8xbf16>
    %c0_3 = arith.constant 0 : index
    %c0_4 = arith.constant 0 : index
    %c0_5 = arith.constant 0 : index
    %c0_6 = arith.constant 0 : index
    %2 = vector.load %arg3[%c0_3, %c0_4, %c0_5, %c0_6] : memref<1x1x8x8xbf16, #tpu.memory_space<vmem>>, vector<1x1x8x8xbf16>
    %3 = vector.shape_cast %2 : vector<1x1x8x8xbf16> to vector<8x8xbf16>
    %c0_7 = arith.constant 0 : index
    %c0_8 = arith.constant 0 : index
    %c0_9 = arith.constant 0 : index
    %c0_10 = arith.constant 0 : index
    %4 = vector.load %arg4[%c0_7, %c0_8, %c0_9, %c0_10] : memref<1x1x8x8xbf16, #tpu.memory_space<vmem>>, vector<1x1x8x8xbf16>
    %5 = vector.shape_cast %4 : vector<1x1x8x8xbf16> to vector<8x8xbf16>
    %cst = arith.constant dense<0.000000e+00> : vector<8x8xf32>
    %6 = tpu.matmul %1, %3, %cst {dimension_numbers = #tpu.dot_dimension_numbers<[1], [0], [0], [1], [0, 0, 1, 1], [], []>} : vector<8x8xbf16>, vector<8x8xbf16>, vector<8x8xf32> -> vector<8x8xf32>
    %cst_11 = arith.constant 0.353553385 : f32
    %7 = vector.broadcast %cst_11 : f32 to vector<8x8xf32>
    %8 = arith.mulf %6, %7 : vector<8x8xf32>
    %cst_12 = arith.constant dense<0xFF800000> : vector<8xf32>
    %9 = vector.multi_reduction <maximumf>, %8, %cst_12 [1] : vector<8x8xf32> to vector<8xf32>
    %10 = vector.shape_cast %9 : vector<8xf32> to vector<8x1xf32>
    %11 = vector.broadcast %10 : vector<8x1xf32> to vector<8x8xf32>
    %12 = arith.subf %8, %11 : vector<8x8xf32>
    %13 = math.exp %12 : vector<8x8xf32>
    %cst_13 = arith.constant dense<0.000000e+00> : vector<8xf32>
    %14 = vector.multi_reduction <add>, %13, %cst_13 [1] : vector<8x8xf32> to vector<8xf32>
    %15 = vector.shape_cast %14 : vector<8xf32> to vector<8x1xf32>
    %16 = tpu.reciprocal %15 {approx = true} : vector<8x1xf32> -> vector<8x1xf32>
    %17 = vector.broadcast %16 : vector<8x1xf32> to vector<8x8xf32>
    %18 = arith.mulf %13, %17 : vector<8x8xf32>
    %19 = arith.truncf %18 : vector<8x8xf32> to vector<8x8xbf16>
    %cst_14 = arith.constant dense<0.000000e+00> : vector<8x8xf32>
    %20 = tpu.matmul %19, %5, %cst_14 {dimension_numbers = #tpu.dot_dimension_numbers<[1], [0], [0], [1], [0, 0, 1, 1], [], []>} : vector<8x8xbf16>, vector<8x8xbf16>, vector<8x8xf32> -> vector<8x8xf32>
    %21 = arith.truncf %20 : vector<8x8xf32> to vector<8x8xbf16>
    %c0_15 = arith.constant 0 : index
    %c0_16 = arith.constant 0 : index
    %c0_17 = arith.constant 0 : index
    %c0_18 = arith.constant 0 : index
    %22 = vector.load %arg5[%c0_15, %c0_16, %c0_17, %c0_18] : memref<1x1x8x8xbf16, #tpu.memory_space<vmem>>, vector<1x1x8x8xbf16>
    %23 = vector.shape_cast %22 : vector<1x1x8x8xbf16> to vector<8x8xbf16>
    %24 = vector.shape_cast %21 : vector<8x8xbf16> to vector<1x1x8x8xbf16>
    tpu.vector_store %arg5[%c0_15, %c0_16, %c0_17, %c0_18], %24 {strides = array<i32>} : memref<1x1x8x8xbf16, #tpu.memory_space<vmem>>, vector<1x1x8x8xbf16>,
    %25 = arith.extf %5 : vector<8x8xbf16> to vector<8x8xf32>
    %cst_19 = arith.constant dense<0.000000e+00> : vector<8xf32>
    %26 = vector.multi_reduction <add>, %25, %cst_19 [0] : vector<8x8xf32> to vector<8xf32>
    %27 = vector.shape_cast %26 : vector<8xf32> to vector<1x8xf32>
    %cst_20 = arith.constant 8.000000e+00 : f32
    %28 = vector.broadcast %cst_20 : f32 to vector<1x8xf32>
    %29 = arith.divf %27, %28 : vector<1x8xf32>
    %30 = arith.truncf %29 : vector<1x8xf32> to vector<1x8xbf16>
    %c0_21 = arith.constant 0 : index
    %c0_22 = arith.constant 0 : index
    %c0_23 = arith.constant 0 : index
    %c0_24 = arith.constant 0 : index
    %31 = vector.load %arg6[%c0_21, %c0_22, %c0_23, %c0_24] : memref<1x1x1x8xbf16, #tpu.memory_space<vmem>>, vector<1x1x1x8xbf16>
    %32 = vector.shape_cast %31 : vector<1x1x1x8xbf16> to vector<1x8xbf16>
    %33 = vector.shape_cast %30 : vector<1x8xbf16> to vector<1x1x1x8xbf16>
    tpu.vector_store %arg6[%c0_21, %c0_22, %c0_23, %c0_24], %33 {strides = array<i32>} : memref<1x1x1x8xbf16, #tpu.memory_space<vmem>>, vector<1x1x1x8xbf16>,
    return
  }
  func.func @transform_0(%arg0: i32, %arg1: i32) -> (i32, i32, i32, i32) {
    %c0_i32 = arith.constant 0 : i32
    %c0_i32_0 = arith.constant 0 : i32
    %c0_i32_1 = arith.constant 0 : i32
    return %arg0, %arg1, %c0_i32, %c0_i32_0 : i32, i32, i32, i32
  }
  func.func @transform_1(%arg0: i32, %arg1: i32) -> (i32, i32, i32, i32) {
    %c0_i32 = arith.constant 0 : i32
    %c0_i32_0 = arith.constant 0 : i32
    %c0_i32_1 = arith.constant 0 : i32
    return %arg0, %arg1, %c0_i32, %c0_i32_0 : i32, i32, i32, i32
  }
  func.func @transform_2(%arg0: i32, %arg1: i32) -> (i32, i32, i32, i32) {
    %c0_i32 = arith.constant 0 : i32
    %c0_i32_0 = arith.constant 0 : i32
    %c0_i32_1 = arith.constant 0 : i32
    return %arg0, %arg1, %c0_i32, %c0_i32_0 : i32, i32, i32, i32
  }
  func.func @transform_3(%arg0: i32, %arg1: i32) -> (i32, i32, i32, i32) {
    %c0_i32 = arith.constant 0 : i32
    %c0_i32_0 = arith.constant 0 : i32
    %c0_i32_1 = arith.constant 0 : i32
    return %arg0, %arg1, %c0_i32, %c0_i32_0 : i32, i32, i32, i32
  }
  func.func @transform_4(%arg0: i32, %arg1: i32) -> (i32, i32, i32, i32) {
    %c0_i32 = arith.constant 0 : i32
    %c0_i32_0 = arith.constant 0 : i32
    %c0_i32_1 = arith.constant 0 : i32
    return %arg0, %arg1, %c0_i32, %c0_i32_0 : i32, i32, i32, i32
  }
}

module attributes {stable_mosaic.version = 11 : i64} {
  func.func @_linear_res_ln_kernel(%arg0: i32, %arg1: memref<16x32xbf16, #tpu.memory_space<vmem>>, %arg2: memref<32x32xbf16, #tpu.memory_space<vmem>>, %arg3: memref<1x32xf32, #tpu.memory_space<vmem>>, %arg4: memref<16x32xbf16, #tpu.memory_space<vmem>>, %arg5: memref<1x32xf32, #tpu.memory_space<vmem>>, %arg6: memref<1x32xf32, #tpu.memory_space<vmem>>, %arg7: memref<16x32xbf16, #tpu.memory_space<vmem>>) attributes {dimension_semantics = [#tpu.dimension_semantics<parallel>], iteration_bounds = array<i64: 1>, scalar_prefetch = 0 : i64, scratch_operands = 0 : i64, tpu.core_type = #tpu.core_type<tc>, window_params = [{transform_indices = @transform_0, window_bounds = array<i64: 16, 32>}, {pipeline_mode = #tpu.pipeline_mode<synchronous>, transform_indices = @transform_1, window_bounds = array<i64: 32, 32>}, {pipeline_mode = #tpu.pipeline_mode<synchronous>, transform_indices = @transform_2, window_bounds = array<i64: 1, 32>}, {transform_indices = @transform_3, window_bounds = array<i64: 16, 32>}, {pipeline_mode = #tpu.pipeline_mode<synchronous>, transform_indices = @transform_4, window_bounds = array<i64: 1, 32>}, {pipeline_mode = #tpu.pipeline_mode<synchronous>, transform_indices = @transform_5, window_bounds = array<i64: 1, 32>}, {transform_indices = @transform_6, window_bounds = array<i64: 16, 32>}]} {
    %c0 = arith.constant 0 : index
    %c0_0 = arith.constant 0 : index
    %0 = vector.load %arg1[%c0, %c0_0] : memref<16x32xbf16, #tpu.memory_space<vmem>>, vector<16x32xbf16>
    %c0_1 = arith.constant 0 : index
    %c0_2 = arith.constant 0 : index
    %1 = vector.load %arg2[%c0_1, %c0_2] : memref<32x32xbf16, #tpu.memory_space<vmem>>, vector<32x32xbf16>
    %cst = arith.constant dense<0.000000e+00> : vector<16x32xf32>
    %2 = tpu.matmul %0, %1, %cst {dimension_numbers = #tpu.dot_dimension_numbers<[1], [0], [0], [1], [0, 0, 1, 1], [], []>} : vector<16x32xbf16>, vector<32x32xbf16>, vector<16x32xf32> -> vector<16x32xf32>
    %c0_3 = arith.constant 0 : index
    %c0_4 = arith.constant 0 : index
    %3 = vector.load %arg3[%c0_3, %c0_4] : memref<1x32xf32, #tpu.memory_space<vmem>>, vector<1x32xf32>
    %4 = vector.broadcast %3 : vector<1x32xf32> to vector<16x32xf32>
    %5 = arith.addf %2, %4 : vector<16x32xf32>
    %c0_5 = arith.constant 0 : index
    %c0_6 = arith.constant 0 : index
    %6 = vector.load %arg4[%c0_5, %c0_6] : memref<16x32xbf16, #tpu.memory_space<vmem>>, vector<16x32xbf16>
    %7 = arith.extf %6 : vector<16x32xbf16> to vector<16x32xf32>
    %8 = arith.addf %7, %5 : vector<16x32xf32>
    %c0_7 = arith.constant 0 : index
    %c0_8 = arith.constant 0 : index
    %9 = vector.load %arg5[%c0_7, %c0_8] : memref<1x32xf32, #tpu.memory_space<vmem>>, vector<1x32xf32>
    %c0_9 = arith.constant 0 : index
    %c0_10 = arith.constant 0 : index
    %10 = vector.load %arg6[%c0_9, %c0_10] : memref<1x32xf32, #tpu.memory_space<vmem>>, vector<1x32xf32>
    %cst_11 = arith.constant dense<0.000000e+00> : vector<16xf32>
    %11 = vector.multi_reduction <add>, %8, %cst_11 [1] : vector<16x32xf32> to vector<16xf32>
    %12 = vector.shape_cast %11 : vector<16xf32> to vector<16x1xf32>
    %cst_12 = arith.constant 3.200000e+01 : f32
    %13 = vector.broadcast %cst_12 : f32 to vector<16x1xf32>
    %14 = arith.divf %12, %13 : vector<16x1xf32>
    %15 = vector.broadcast %14 : vector<16x1xf32> to vector<16x32xf32>
    %16 = arith.subf %8, %15 : vector<16x32xf32>
    %17 = arith.mulf %16, %16 : vector<16x32xf32>
    %cst_13 = arith.constant dense<0.000000e+00> : vector<16xf32>
    %18 = vector.multi_reduction <add>, %17, %cst_13 [1] : vector<16x32xf32> to vector<16xf32>
    %19 = vector.shape_cast %18 : vector<16xf32> to vector<16x1xf32>
    %cst_14 = arith.constant 3.200000e+01 : f32
    %20 = vector.broadcast %cst_14 : f32 to vector<16x1xf32>
    %21 = arith.divf %19, %20 : vector<16x1xf32>
    %22 = vector.broadcast %14 : vector<16x1xf32> to vector<16x32xf32>
    %23 = arith.subf %8, %22 : vector<16x32xf32>
    %cst_15 = arith.constant 9.99999974E-6 : f32
    %24 = vector.broadcast %cst_15 : f32 to vector<16x1xf32>
    %25 = arith.addf %21, %24 : vector<16x1xf32>
    %26 = math.rsqrt %25 : vector<16x1xf32>
    %27 = vector.broadcast %26 : vector<16x1xf32> to vector<16x32xf32>
    %28 = arith.mulf %23, %27 : vector<16x32xf32>
    %29 = vector.broadcast %9 : vector<1x32xf32> to vector<16x32xf32>
    %30 = arith.mulf %28, %29 : vector<16x32xf32>
    %31 = vector.broadcast %10 : vector<1x32xf32> to vector<16x32xf32>
    %32 = arith.addf %30, %31 : vector<16x32xf32>
    %33 = arith.truncf %32 : vector<16x32xf32> to vector<16x32xbf16>
    %c0_16 = arith.constant 0 : index
    %c0_17 = arith.constant 0 : index
    %34 = vector.load %arg7[%c0_16, %c0_17] : memref<16x32xbf16, #tpu.memory_space<vmem>>, vector<16x32xbf16>
    tpu.vector_store %arg7[%c0_16, %c0_17], %33 {strides = array<i32>} : memref<16x32xbf16, #tpu.memory_space<vmem>>, vector<16x32xbf16>,
    return
  }
  func.func @transform_0(%arg0: i32) -> (i32, i32) {
    %c0_i32 = arith.constant 0 : i32
    %c0_i32_0 = arith.constant 0 : i32
    return %arg0, %c0_i32 : i32, i32
  }
  func.func @transform_1(%arg0: i32) -> (i32, i32) {
    %c0_i32 = arith.constant 0 : i32
    %c0_i32_0 = arith.constant 0 : i32
    %c0_i32_1 = arith.constant 0 : i32
    return %c0_i32, %c0_i32_0 : i32, i32
  }
  func.func @transform_2(%arg0: i32) -> (i32, i32) {
    %c0_i32 = arith.constant 0 : i32
    %c0_i32_0 = arith.constant 0 : i32
    %c0_i32_1 = arith.constant 0 : i32
    return %c0_i32, %c0_i32_0 : i32, i32
  }
  func.func @transform_3(%arg0: i32) -> (i32, i32) {
    %c0_i32 = arith.constant 0 : i32
    %c0_i32_0 = arith.constant 0 : i32
    return %arg0, %c0_i32 : i32, i32
  }
  func.func @transform_4(%arg0: i32) -> (i32, i32) {
    %c0_i32 = arith.constant 0 : i32
    %c0_i32_0 = arith.constant 0 : i32
    %c0_i32_1 = arith.constant 0 : i32
    return %c0_i32, %c0_i32_0 : i32, i32
  }
  func.func @transform_5(%arg0: i32) -> (i32, i32) {
    %c0_i32 = arith.constant 0 : i32
    %c0_i32_0 = arith.constant 0 : i32
    %c0_i32_1 = arith.constant 0 : i32
    return %c0_i32, %c0_i32_0 : i32, i32
  }
  func.func @transform_6(%arg0: i32) -> (i32, i32) {
    %c0_i32 = arith.constant 0 : i32
    %c0_i32_0 = arith.constant 0 : i32
    return %arg0, %c0_i32 : i32, i32
  }
}

module attributes {stable_mosaic.version = 11 : i64} {
  func.func @_linear_gelu_kernel(%arg0: i32, %arg1: memref<16x32xbf16, #tpu.memory_space<vmem>>, %arg2: memref<32x64xbf16, #tpu.memory_space<vmem>>, %arg3: memref<1x64xf32, #tpu.memory_space<vmem>>, %arg4: memref<16x64xbf16, #tpu.memory_space<vmem>>) attributes {dimension_semantics = [#tpu.dimension_semantics<parallel>], iteration_bounds = array<i64: 1>, scalar_prefetch = 0 : i64, scratch_operands = 0 : i64, tpu.core_type = #tpu.core_type<tc>, window_params = [{transform_indices = @transform_0, window_bounds = array<i64: 16, 32>}, {pipeline_mode = #tpu.pipeline_mode<synchronous>, transform_indices = @transform_1, window_bounds = array<i64: 32, 64>}, {pipeline_mode = #tpu.pipeline_mode<synchronous>, transform_indices = @transform_2, window_bounds = array<i64: 1, 64>}, {transform_indices = @transform_3, window_bounds = array<i64: 16, 64>}]} {
    %c0 = arith.constant 0 : index
    %c0_0 = arith.constant 0 : index
    %0 = vector.load %arg1[%c0, %c0_0] : memref<16x32xbf16, #tpu.memory_space<vmem>>, vector<16x32xbf16>
    %c0_1 = arith.constant 0 : index
    %c0_2 = arith.constant 0 : index
    %1 = vector.load %arg2[%c0_1, %c0_2] : memref<32x64xbf16, #tpu.memory_space<vmem>>, vector<32x64xbf16>
    %cst = arith.constant dense<0.000000e+00> : vector<16x64xf32>
    %2 = tpu.matmul %0, %1, %cst {dimension_numbers = #tpu.dot_dimension_numbers<[1], [0], [0], [1], [0, 0, 1, 1], [], []>} : vector<16x32xbf16>, vector<32x64xbf16>, vector<16x64xf32> -> vector<16x64xf32>
    %c0_3 = arith.constant 0 : index
    %c0_4 = arith.constant 0 : index
    %3 = vector.load %arg3[%c0_3, %c0_4] : memref<1x64xf32, #tpu.memory_space<vmem>>, vector<1x64xf32>
    %4 = vector.broadcast %3 : vector<1x64xf32> to vector<16x64xf32>
    %5 = arith.addf %2, %4 : vector<16x64xf32>
    %cst_5 = arith.constant 5.000000e-01 : f32
    %6 = vector.broadcast %cst_5 : f32 to vector<16x64xf32>
    %7 = arith.mulf %6, %5 : vector<16x64xf32>
    %cst_6 = arith.constant 0.707106769 : f32
    %8 = vector.broadcast %cst_6 : f32 to vector<16x64xf32>
    %9 = arith.mulf %5, %8 : vector<16x64xf32>
    %cst_7 = arith.constant 0.000000e+00 : f32
    %10 = vector.broadcast %cst_7 : f32 to vector<16x64xf32>
    %11 = arith.cmpf oge, %9, %10 : vector<16x64xf32>
    %cst_8 = arith.constant 1.000000e+00 : f32
    %cst_9 = arith.constant -1.000000e+00 : f32
    %12 = vector.broadcast %cst_8 : f32 to vector<16x64xf32>
    %13 = vector.broadcast %cst_9 : f32 to vector<16x64xf32>
    %14 = arith.select %11, %12, %13 : vector<16x64xi1>, vector<16x64xf32>
    %15 = math.absf %9 : vector<16x64xf32>
    %cst_10 = arith.constant 0.327591091 : f32
    %16 = vector.broadcast %cst_10 : f32 to vector<16x64xf32>
    %17 = arith.mulf %16, %15 : vector<16x64xf32>
    %cst_11 = arith.constant 1.000000e+00 : f32
    %18 = vector.broadcast %cst_11 : f32 to vector<16x64xf32>
    %19 = arith.addf %18, %17 : vector<16x64xf32>
    %cst_12 = arith.constant 1.000000e+00 : f32
    %20 = vector.broadcast %cst_12 : f32 to vector<16x64xf32>
    %21 = arith.divf %20, %19 : vector<16x64xf32>
    %cst_13 = arith.constant 1.06140542 : f32
    %22 = vector.broadcast %cst_13 : f32 to vector<16x64xf32>
    %23 = arith.mulf %22, %21 : vector<16x64xf32>
    %cst_14 = arith.constant -1.45315206 : f32
    %24 = vector.broadcast %cst_14 : f32 to vector<16x64xf32>
    %25 = arith.addf %23, %24 : vector<16x64xf32>
    %26 = arith.mulf %25, %21 : vector<16x64xf32>
    %cst_15 = arith.constant 1.42141378 : f32
    %27 = vector.broadcast %cst_15 : f32 to vector<16x64xf32>
    %28 = arith.addf %26, %27 : vector<16x64xf32>
    %29 = arith.mulf %28, %21 : vector<16x64xf32>
    %cst_16 = arith.constant -0.284496725 : f32
    %30 = vector.broadcast %cst_16 : f32 to vector<16x64xf32>
    %31 = arith.addf %29, %30 : vector<16x64xf32>
    %32 = arith.mulf %31, %21 : vector<16x64xf32>
    %cst_17 = arith.constant 0.254829586 : f32
    %33 = vector.broadcast %cst_17 : f32 to vector<16x64xf32>
    %34 = arith.addf %32, %33 : vector<16x64xf32>
    %35 = arith.mulf %34, %21 : vector<16x64xf32>
    %cst_18 = arith.constant 0.000000e+00 : f32
    %36 = vector.broadcast %cst_18 : f32 to vector<16x64xf32>
    %37 = arith.subf %36, %15 : vector<16x64xf32>
    %38 = arith.mulf %37, %15 : vector<16x64xf32>
    %39 = math.exp %38 : vector<16x64xf32>
    %40 = arith.mulf %35, %39 : vector<16x64xf32>
    %cst_19 = arith.constant 1.000000e+00 : f32
    %41 = vector.broadcast %cst_19 : f32 to vector<16x64xf32>
    %42 = arith.subf %41, %40 : vector<16x64xf32>
    %43 = arith.mulf %14, %42 : vector<16x64xf32>
    %cst_20 = arith.constant 1.000000e+00 : f32
    %44 = vector.broadcast %cst_20 : f32 to vector<16x64xf32>
    %45 = arith.addf %44, %43 : vector<16x64xf32>
    %46 = arith.mulf %7, %45 : vector<16x64xf32>
    %47 = arith.truncf %46 : vector<16x64xf32> to vector<16x64xbf16>
    %c0_21 = arith.constant 0 : index
    %c0_22 = arith.constant 0 : index
    %48 = vector.load %arg4[%c0_21, %c0_22] : memref<16x64xbf16, #tpu.memory_space<vmem>>, vector<16x64xbf16>
    tpu.vector_store %arg4[%c0_21, %c0_22], %47 {strides = array<i32>} : memref<16x64xbf16, #tpu.memory_space<vmem>>, vector<16x64xbf16>,
    return
  }
  func.func @transform_0(%arg0: i32) -> (i32, i32) {
    %c0_i32 = arith.constant 0 : i32
    %c0_i32_0 = arith.constant 0 : i32
    return %arg0, %c0_i32 : i32, i32
  }
  func.func @transform_1(%arg0: i32) -> (i32, i32) {
    %c0_i32 = arith.constant 0 : i32
    %c0_i32_0 = arith.constant 0 : i32
    %c0_i32_1 = arith.constant 0 : i32
    return %c0_i32, %c0_i32_0 : i32, i32
  }
  func.func @transform_2(%arg0: i32) -> (i32, i32) {
    %c0_i32 = arith.constant 0 : i32
    %c0_i32_0 = arith.constant 0 : i32
    %c0_i32_1 = arith.constant 0 : i32
    return %c0_i32, %c0_i32_0 : i32, i32
  }
  func.func @transform_3(%arg0: i32) -> (i32, i32) {
    %c0_i32 = arith.constant 0 : i32
    %c0_i32_0 = arith.constant 0 : i32
    return %arg0, %c0_i32 : i32, i32
  }
}

module attributes {stable_mosaic.version = 11 : i64} {
  func.func @_linear_res_ln_kernel(%arg0: i32, %arg1: memref<16x64xbf16, #tpu.memory_space<vmem>>, %arg2: memref<64x32xbf16, #tpu.memory_space<vmem>>, %arg3: memref<1x32xf32, #tpu.memory_space<vmem>>, %arg4: memref<16x32xbf16, #tpu.memory_space<vmem>>, %arg5: memref<1x32xf32, #tpu.memory_space<vmem>>, %arg6: memref<1x32xf32, #tpu.memory_space<vmem>>, %arg7: memref<16x32xbf16, #tpu.memory_space<vmem>>) attributes {dimension_semantics = [#tpu.dimension_semantics<parallel>], iteration_bounds = array<i64: 1>, scalar_prefetch = 0 : i64, scratch_operands = 0 : i64, tpu.core_type = #tpu.core_type<tc>, window_params = [{transform_indices = @transform_0, window_bounds = array<i64: 16, 64>}, {pipeline_mode = #tpu.pipeline_mode<synchronous>, transform_indices = @transform_1, window_bounds = array<i64: 64, 32>}, {pipeline_mode = #tpu.pipeline_mode<synchronous>, transform_indices = @transform_2, window_bounds = array<i64: 1, 32>}, {transform_indices = @transform_3, window_bounds = array<i64: 16, 32>}, {pipeline_mode = #tpu.pipeline_mode<synchronous>, transform_indices = @transform_4, window_bounds = array<i64: 1, 32>}, {pipeline_mode = #tpu.pipeline_mode<synchronous>, transform_indices = @transform_5, window_bounds = array<i64: 1, 32>}, {transform_indices = @transform_6, window_bounds = array<i64: 16, 32>}]} {
    %c0 = arith.constant 0 : index
    %c0_0 = arith.constant 0 : index
    %0 = vector.load %arg1[%c0, %c0_0] : memref<16x64xbf16, #tpu.memory_space<vmem>>, vector<16x64xbf16>
    %c0_1 = arith.constant 0 : index
    %c0_2 = arith.constant 0 : index
    %1 = vector.load %arg2[%c0_1, %c0_2] : memref<64x32xbf16, #tpu.memory_space<vmem>>, vector<64x32xbf16>
    %cst = arith.constant dense<0.000000e+00> : vector<16x32xf32>
    %2 = tpu.matmul %0, %1, %cst {dimension_numbers = #tpu.dot_dimension_numbers<[1], [0], [0], [1], [0, 0, 1, 1], [], []>} : vector<16x64xbf16>, vector<64x32xbf16>, vector<16x32xf32> -> vector<16x32xf32>
    %c0_3 = arith.constant 0 : index
    %c0_4 = arith.constant 0 : index
    %3 = vector.load %arg3[%c0_3, %c0_4] : memref<1x32xf32, #tpu.memory_space<vmem>>, vector<1x32xf32>
    %4 = vector.broadcast %3 : vector<1x32xf32> to vector<16x32xf32>
    %5 = arith.addf %2, %4 : vector<16x32xf32>
    %c0_5 = arith.constant 0 : index
    %c0_6 = arith.constant 0 : index
    %6 = vector.load %arg4[%c0_5, %c0_6] : memref<16x32xbf16, #tpu.memory_space<vmem>>, vector<16x32xbf16>
    %7 = arith.extf %6 : vector<16x32xbf16> to vector<16x32xf32>
    %8 = arith.addf %7, %5 : vector<16x32xf32>
    %c0_7 = arith.constant 0 : index
    %c0_8 = arith.constant 0 : index
    %9 = vector.load %arg5[%c0_7, %c0_8] : memref<1x32xf32, #tpu.memory_space<vmem>>, vector<1x32xf32>
    %c0_9 = arith.constant 0 : index
    %c0_10 = arith.constant 0 : index
    %10 = vector.load %arg6[%c0_9, %c0_10] : memref<1x32xf32, #tpu.memory_space<vmem>>, vector<1x32xf32>
    %cst_11 = arith.constant dense<0.000000e+00> : vector<16xf32>
    %11 = vector.multi_reduction <add>, %8, %cst_11 [1] : vector<16x32xf32> to vector<16xf32>
    %12 = vector.shape_cast %11 : vector<16xf32> to vector<16x1xf32>
    %cst_12 = arith.constant 3.200000e+01 : f32
    %13 = vector.broadcast %cst_12 : f32 to vector<16x1xf32>
    %14 = arith.divf %12, %13 : vector<16x1xf32>
    %15 = vector.broadcast %14 : vector<16x1xf32> to vector<16x32xf32>
    %16 = arith.subf %8, %15 : vector<16x32xf32>
    %17 = arith.mulf %16, %16 : vector<16x32xf32>
    %cst_13 = arith.constant dense<0.000000e+00> : vector<16xf32>
    %18 = vector.multi_reduction <add>, %17, %cst_13 [1] : vector<16x32xf32> to vector<16xf32>
    %19 = vector.shape_cast %18 : vector<16xf32> to vector<16x1xf32>
    %cst_14 = arith.constant 3.200000e+01 : f32
    %20 = vector.broadcast %cst_14 : f32 to vector<16x1xf32>
    %21 = arith.divf %19, %20 : vector<16x1xf32>
    %22 = vector.broadcast %14 : vector<16x1xf32> to vector<16x32xf32>
    %23 = arith.subf %8, %22 : vector<16x32xf32>
    %cst_15 = arith.constant 9.99999974E-6 : f32
    %24 = vector.broadcast %cst_15 : f32 to vector<16x1xf32>
    %25 = arith.addf %21, %24 : vector<16x1xf32>
    %26 = math.rsqrt %25 : vector<16x1xf32>
    %27 = vector.broadcast %26 : vector<16x1xf32> to vector<16x32xf32>
    %28 = arith.mulf %23, %27 : vector<16x32xf32>
    %29 = vector.broadcast %9 : vector<1x32xf32> to vector<16x32xf32>
    %30 = arith.mulf %28, %29 : vector<16x32xf32>
    %31 = vector.broadcast %10 : vector<1x32xf32> to vector<16x32xf32>
    %32 = arith.addf %30, %31 : vector<16x32xf32>
    %33 = arith.truncf %32 : vector<16x32xf32> to vector<16x32xbf16>
    %c0_16 = arith.constant 0 : index
    %c0_17 = arith.constant 0 : index
    %34 = vector.load %arg7[%c0_16, %c0_17] : memref<16x32xbf16, #tpu.memory_space<vmem>>, vector<16x32xbf16>
    tpu.vector_store %arg7[%c0_16, %c0_17], %33 {strides = array<i32>} : memref<16x32xbf16, #tpu.memory_space<vmem>>, vector<16x32xbf16>,
    return
  }
  func.func @transform_0(%arg0: i32) -> (i32, i32) {
    %c0_i32 = arith.constant 0 : i32
    %c0_i32_0 = arith.constant 0 : i32
    return %arg0, %c0_i32 : i32, i32
  }
  func.func @transform_1(%arg0: i32) -> (i32, i32) {
    %c0_i32 = arith.constant 0 : i32
    %c0_i32_0 = arith.constant 0 : i32
    %c0_i32_1 = arith.constant 0 : i32
    return %c0_i32, %c0_i32_0 : i32, i32
  }
  func.func @transform_2(%arg0: i32) -> (i32, i32) {
    %c0_i32 = arith.constant 0 : i32
    %c0_i32_0 = arith.constant 0 : i32
    %c0_i32_1 = arith.constant 0 : i32
    return %c0_i32, %c0_i32_0 : i32, i32
  }
  func.func @transform_3(%arg0: i32) -> (i32, i32) {
    %c0_i32 = arith.constant 0 : i32
    %c0_i32_0 = arith.constant 0 : i32
    return %arg0, %c0_i32 : i32, i32
  }
  func.func @transform_4(%arg0: i32) -> (i32, i32) {
    %c0_i32 = arith.constant 0 : i32
    %c0_i32_0 = arith.constant 0 : i32
    %c0_i32_1 = arith.constant 0 : i32
    return %c0_i32, %c0_i32_0 : i32, i32
  }
  func.func @transform_5(%arg0: i32) -> (i32, i32) {
    %c0_i32 = arith.constant 0 : i32
    %c0_i32_0 = arith.constant 0 : i32
    %c0_i32_1 = arith.constant 0 : i32
    return %c0_i32, %c0_i32_0 : i32, i32
  }
  func.func @transform_6(%arg0: i32) -> (i32, i32) {
    %c0_i32 = arith.constant 0 : i32
    %c0_i32_0 = arith.constant 0 : i32
    return %arg0, %c0_i32 : i32, i32
  }
}

module attributes {stable_mosaic.version = 11 : i64} {
  func.func @_ln_gelu_mask_kernel(%arg0: i32, %arg1: memref<16x32xbf16, #tpu.memory_space<vmem>>, %arg2: memref<1x32xf32, #tpu.memory_space<vmem>>, %arg3: memref<1x32xf32, #tpu.memory_space<vmem>>, %arg4: memref<16x1xf32, #tpu.memory_space<vmem>>, %arg5: memref<16x32xbf16, #tpu.memory_space<vmem>>) attributes {dimension_semantics = [#tpu.dimension_semantics<parallel>], iteration_bounds = array<i64: 1>, scalar_prefetch = 0 : i64, scratch_operands = 0 : i64, tpu.core_type = #tpu.core_type<tc>, window_params = [{transform_indices = @transform_0, window_bounds = array<i64: 16, 32>}, {pipeline_mode = #tpu.pipeline_mode<synchronous>, transform_indices = @transform_1, window_bounds = array<i64: 1, 32>}, {pipeline_mode = #tpu.pipeline_mode<synchronous>, transform_indices = @transform_2, window_bounds = array<i64: 1, 32>}, {transform_indices = @transform_3, window_bounds = array<i64: 16, 1>}, {transform_indices = @transform_4, window_bounds = array<i64: 16, 32>}]} {
    %c0 = arith.constant 0 : index
    %c0_0 = arith.constant 0 : index
    %0 = vector.load %arg1[%c0, %c0_0] : memref<16x32xbf16, #tpu.memory_space<vmem>>, vector<16x32xbf16>
    %1 = arith.extf %0 : vector<16x32xbf16> to vector<16x32xf32>
    %c0_1 = arith.constant 0 : index
    %c0_2 = arith.constant 0 : index
    %2 = vector.load %arg2[%c0_1, %c0_2] : memref<1x32xf32, #tpu.memory_space<vmem>>, vector<1x32xf32>
    %c0_3 = arith.constant 0 : index
    %c0_4 = arith.constant 0 : index
    %3 = vector.load %arg3[%c0_3, %c0_4] : memref<1x32xf32, #tpu.memory_space<vmem>>, vector<1x32xf32>
    %cst = arith.constant dense<0.000000e+00> : vector<16xf32>
    %4 = vector.multi_reduction <add>, %1, %cst [1] : vector<16x32xf32> to vector<16xf32>
    %5 = vector.shape_cast %4 : vector<16xf32> to vector<16x1xf32>
    %cst_5 = arith.constant 3.200000e+01 : f32
    %6 = vector.broadcast %cst_5 : f32 to vector<16x1xf32>
    %7 = arith.divf %5, %6 : vector<16x1xf32>
    %8 = vector.broadcast %7 : vector<16x1xf32> to vector<16x32xf32>
    %9 = arith.subf %1, %8 : vector<16x32xf32>
    %10 = arith.mulf %9, %9 : vector<16x32xf32>
    %cst_6 = arith.constant dense<0.000000e+00> : vector<16xf32>
    %11 = vector.multi_reduction <add>, %10, %cst_6 [1] : vector<16x32xf32> to vector<16xf32>
    %12 = vector.shape_cast %11 : vector<16xf32> to vector<16x1xf32>
    %cst_7 = arith.constant 3.200000e+01 : f32
    %13 = vector.broadcast %cst_7 : f32 to vector<16x1xf32>
    %14 = arith.divf %12, %13 : vector<16x1xf32>
    %15 = vector.broadcast %7 : vector<16x1xf32> to vector<16x32xf32>
    %16 = arith.subf %1, %15 : vector<16x32xf32>
    %cst_8 = arith.constant 9.99999974E-6 : f32
    %17 = vector.broadcast %cst_8 : f32 to vector<16x1xf32>
    %18 = arith.addf %14, %17 : vector<16x1xf32>
    %19 = math.rsqrt %18 : vector<16x1xf32>
    %20 = vector.broadcast %19 : vector<16x1xf32> to vector<16x32xf32>
    %21 = arith.mulf %16, %20 : vector<16x32xf32>
    %22 = vector.broadcast %2 : vector<1x32xf32> to vector<16x32xf32>
    %23 = arith.mulf %21, %22 : vector<16x32xf32>
    %24 = vector.broadcast %3 : vector<1x32xf32> to vector<16x32xf32>
    %25 = arith.addf %23, %24 : vector<16x32xf32>
    %cst_9 = arith.constant 5.000000e-01 : f32
    %26 = vector.broadcast %cst_9 : f32 to vector<16x32xf32>
    %27 = arith.mulf %26, %25 : vector<16x32xf32>
    %cst_10 = arith.constant 0.707106769 : f32
    %28 = vector.broadcast %cst_10 : f32 to vector<16x32xf32>
    %29 = arith.mulf %25, %28 : vector<16x32xf32>
    %cst_11 = arith.constant 0.000000e+00 : f32
    %30 = vector.broadcast %cst_11 : f32 to vector<16x32xf32>
    %31 = arith.cmpf oge, %29, %30 : vector<16x32xf32>
    %cst_12 = arith.constant 1.000000e+00 : f32
    %cst_13 = arith.constant -1.000000e+00 : f32
    %32 = vector.broadcast %cst_12 : f32 to vector<16x32xf32>
    %33 = vector.broadcast %cst_13 : f32 to vector<16x32xf32>
    %34 = arith.select %31, %32, %33 : vector<16x32xi1>, vector<16x32xf32>
    %35 = math.absf %29 : vector<16x32xf32>
    %cst_14 = arith.constant 0.327591091 : f32
    %36 = vector.broadcast %cst_14 : f32 to vector<16x32xf32>
    %37 = arith.mulf %36, %35 : vector<16x32xf32>
    %cst_15 = arith.constant 1.000000e+00 : f32
    %38 = vector.broadcast %cst_15 : f32 to vector<16x32xf32>
    %39 = arith.addf %38, %37 : vector<16x32xf32>
    %cst_16 = arith.constant 1.000000e+00 : f32
    %40 = vector.broadcast %cst_16 : f32 to vector<16x32xf32>
    %41 = arith.divf %40, %39 : vector<16x32xf32>
    %cst_17 = arith.constant 1.06140542 : f32
    %42 = vector.broadcast %cst_17 : f32 to vector<16x32xf32>
    %43 = arith.mulf %42, %41 : vector<16x32xf32>
    %cst_18 = arith.constant -1.45315206 : f32
    %44 = vector.broadcast %cst_18 : f32 to vector<16x32xf32>
    %45 = arith.addf %43, %44 : vector<16x32xf32>
    %46 = arith.mulf %45, %41 : vector<16x32xf32>
    %cst_19 = arith.constant 1.42141378 : f32
    %47 = vector.broadcast %cst_19 : f32 to vector<16x32xf32>
    %48 = arith.addf %46, %47 : vector<16x32xf32>
    %49 = arith.mulf %48, %41 : vector<16x32xf32>
    %cst_20 = arith.constant -0.284496725 : f32
    %50 = vector.broadcast %cst_20 : f32 to vector<16x32xf32>
    %51 = arith.addf %49, %50 : vector<16x32xf32>
    %52 = arith.mulf %51, %41 : vector<16x32xf32>
    %cst_21 = arith.constant 0.254829586 : f32
    %53 = vector.broadcast %cst_21 : f32 to vector<16x32xf32>
    %54 = arith.addf %52, %53 : vector<16x32xf32>
    %55 = arith.mulf %54, %41 : vector<16x32xf32>
    %cst_22 = arith.constant 0.000000e+00 : f32
    %56 = vector.broadcast %cst_22 : f32 to vector<16x32xf32>
    %57 = arith.subf %56, %35 : vector<16x32xf32>
    %58 = arith.mulf %57, %35 : vector<16x32xf32>
    %59 = math.exp %58 : vector<16x32xf32>
    %60 = arith.mulf %55, %59 : vector<16x32xf32>
    %cst_23 = arith.constant 1.000000e+00 : f32
    %61 = vector.broadcast %cst_23 : f32 to vector<16x32xf32>
    %62 = arith.subf %61, %60 : vector<16x32xf32>
    %63 = arith.mulf %34, %62 : vector<16x32xf32>
    %cst_24 = arith.constant 1.000000e+00 : f32
    %64 = vector.broadcast %cst_24 : f32 to vector<16x32xf32>
    %65 = arith.addf %64, %63 : vector<16x32xf32>
    %66 = arith.mulf %27, %65 : vector<16x32xf32>
    %c0_25 = arith.constant 0 : index
    %c0_26 = arith.constant 0 : index
    %67 = vector.load %arg4[%c0_25, %c0_26] : memref<16x1xf32, #tpu.memory_space<vmem>>, vector<16x1xf32>
    %68 = vector.broadcast %67 : vector<16x1xf32> to vector<16x32xf32>
    %69 = arith.mulf %66, %68 : vector<16x32xf32>
    %70 = arith.truncf %69 : vector<16x32xf32> to vector<16x32xbf16>
    %c0_27 = arith.constant 0 : index
    %c0_28 = arith.constant 0 : index
    %71 = vector.load %arg5[%c0_27, %c0_28] : memref<16x32xbf16, #tpu.memory_space<vmem>>, vector<16x32xbf16>
    tpu.vector_store %arg5[%c0_27, %c0_28], %70 {strides = array<i32>} : memref<16x32xbf16, #tpu.memory_space<vmem>>, vector<16x32xbf16>,
    return
  }
  func.func @transform_0(%arg0: i32) -> (i32, i32) {
    %c0_i32 = arith.constant 0 : i32
    %c0_i32_0 = arith.constant 0 : i32
    return %arg0, %c0_i32 : i32, i32
  }
  func.func @transform_1(%arg0: i32) -> (i32, i32) {
    %c0_i32 = arith.constant 0 : i32
    %c0_i32_0 = arith.constant 0 : i32
    %c0_i32_1 = arith.constant 0 : i32
    return %c0_i32, %c0_i32_0 : i32, i32
  }
  func.func @transform_2(%arg0: i32) -> (i32, i32) {
    %c0_i32 = arith.constant 0 : i32
    %c0_i32_0 = arith.constant 0 : i32
    %c0_i32_1 = arith.constant 0 : i32
    return %c0_i32, %c0_i32_0 : i32, i32
  }
  func.func @transform_3(%arg0: i32) -> (i32, i32) {
    %c0_i32 = arith.constant 0 : i32
    %c0_i32_0 = arith.constant 0 : i32
    return %arg0, %c0_i32 : i32, i32
  }
  func.func @transform_4(%arg0: i32) -> (i32, i32) {
    %c0_i32 = arith.constant 0 : i32
    %c0_i32_0 = arith.constant 0 : i32
    return %arg0, %c0_i32 : i32, i32
  }
}

</mosaic_0001>

<bundles_post_ra>
// kernel: informer_forward.16
= control target key start
LH: loop header
LB: loop body
LE: loop exit
PB: predicated region body
PF: predicated region fallthrough
CT: control target
= control target key end

     0   :  { %s459_s12 = smov 0   ;;  %s461_s13 = smov 0   ;;  %s498_s0 = inlined_call_operand.vmem [shape: f32[2,8,12], index: 0, kind: input, shape index: {}]   ;;  %s499_s1 = inlined_call_operand.vmem [shape: bf16[12,32], index: 1, kind: input, shape index: {}]   ;;  %s500_s2 = inlined_call_operand.vmem [shape: f32[8,32], index: 2, kind: input, shape index: {}]   ;;  %s501_s3 = inlined_call_operand.vmem [shape: bf16[2,8,32], index: 3, kind: output, shape index: {}]  }
   0x1   :  { %s463_s14 = smov 0  }
   0x2 LB: > { %s25_s15 = sadd.s32 1, %s431_s13  ;;  %p371_p0 = scmp.ge.s32.totalorder %s435_s14, 1  ;;  %s435_s14 = sphi %s463_s14, %s13_s14   ;;  %s431_s13 = sphi %s461_s13, %s503_s13   ;;  %s427_s12 = sphi %s459_s12, %s502_s12  }
   0x3   : > { %p27_p1 = scmp.ge.s32.totalorder %s25_s15, 2  ;;  %p164_p2 = scmp.lt.s32.totalorder %s435_s14, 3 }
   0x5   : > { %s505_s15 = smov (%p27_p1, %s25_s15), 0  ;;  %p165_p3 = pnand %p371_p0, %p164_p2 }
   0x6   : > { %p196_p4 = scmp.lt.s32.totalorder (!%p165_p3), %s427_s12, 1 }
   0x7   : > { %168 = sbr.rel (%p165_p3) target bundleno = 217 (0xd9), region = 32 }
   0xc   : > { %vm229_vm0 = vcmask 1045504   ;;  %v437_v0 = vmov 0.0   ;;  %v412_v1 = vld [vmem:[%s499_s1] sm:$0x3f]   ;;  %vm438_vm1 = vmmov 0   ;;  %s507_s12 = smov (!%p196_p4, %s427_s12), 1 }
   0xd   : > { %380 = vmatprep.subr.bf16.mxu0 %v437_v0  ;;  %382 = vmatprep.mubr.msk.bf16.mxu0 %vm438_vm1, %v437_v0  ;;  %v231_v2 = vsel %vm229_vm0, %v412_v1, 0  ;;  %s372_s18 = sshll.u32 %s507_s12, 3  ;;  %vm225_vm2 = vcmask 97280   ;;  %v219_v5 = vld [vmem:[%s500_s2] sm:$0xff]  ;;  %s373_s24 = sshll.u32 %s507_s12, 2  ;;  %vm274_vm3 = vcmask 257024  }
   0xe   : > { %381 = vmatpush3.bf16.msra.mxu0 %v231_v2  ;;  %s202_s21 = scalar_lea.vmem %s498_s0, %s372_s18  ;;  %s213_s27 = scalar_lea.vmem %s501_s3, %s373_s24 }
   0xf   : > { %v215_v3 = vld [vmem:[%s202_s21] sm:$0xff] }
  0x10   : > { %v216_v4 = vpack.c.bf16 %v215_v3, %v215_v3 }
  0x12   : > { %383 = vmatmul.mubr.msk.bf16.vlgmr.msra.gmra.mxu0 %vm225_vm2, %v216_v4 }
  0xd2   : > { %v267_v6 = vpop.f32.mrf.mxu0 }
  0xd3   : > { %v268_v7 = vadd.f32 %v267_v6, %v219_v5 }
  0xd4   : > { %v384_v8 = vpop.f32.mrf.mxu0 }
  0xd5   : > { %v273_v9 = vpack.c.bf16 %v268_v7, %v268_v7 }
  0xd6   : > { %v270_v10 = vpop.f32.mrf.mxu0 }
  0xd7   : > { %275 = vst.msk [vmem:[%s213_s27] sm:$0xf] %vm274_vm3, %v273_v9 }
  0xd8   : > { %v385_v11 = vpop.f32.mrf.mxu0 }
  0xd9 PF: > { %s13_s14 = sadd.s32 1, %s435_s14   ;;  %s502_s12 = smov %s431_s13 }
  0xda   : > { %p10_p5 = scmp.ge.s32.totalorder %s13_s14, 4   ;;  %s503_s13 = smov %s505_s15 }
  0xdc   :  { %12 = sbr.rel (!%p10_p5) target bundleno = 2 (0x2), region = 65 }

// kernel: informer_forward.17
= control target key start
LH: loop header
LB: loop body
LE: loop exit
PB: predicated region body
PF: predicated region fallthrough
CT: control target
= control target key end

     0   :  { %v130_v0 = vmov 0.0   ;;  %vm131_vm0 = vmmov 0   ;;  %vm45_vm1 = vcmask 261120   ;;  %vm98_vm2 = vcmask 781312   ;;  %s170_s1 = inlined_call_operand.vmem [shape: bf16[32,96], index: 1, kind: input, shape index: {}]   ;;  %s171_s0 = inlined_call_operand.vmem [shape: bf16[16,32], index: 0, kind: input, shape index: {}]   ;;  %s172_s2 = inlined_call_operand.vmem [shape: f32[1,96], index: 2, kind: input, shape index: {}]   ;;  %s173_s3 = inlined_call_operand.vmem [shape: bf16[16,96], index: 3, kind: output, shape index: {}]  }
   0x1   :  { %117 = vmatprep.subr.bf16.mxu0 %v130_v0  ;;  %v127_v1 = vld [vmem:[%s170_s1 + $0x8] sm:$0xff]   ;;  %121 = vmatprep.mubr.msk.bf16.mxu0 %vm131_vm0, %v130_v0  ;;  %v128_v2 = vld [vmem:[%s170_s1] sm:$0xff]  }
   0x2   :  { %118 = vmatpush3.bf16.msra.mxu0 %v127_v1  ;;  %v129_v3 = vld [vmem:[%s171_s0] sm:$0xff]  }
   0x3   :  { %119 = vmatprep.subr.bf16.mxu0 %v130_v0  ;;  %v105_v4 = vld [vmem:[%s172_s2] ss:$0 sm:$0xff] }
   0x6   :  { %120 = vmatpush3.bf16.msra.mxu0 %v128_v2 }
   0x9   :  { %122 = vmatmul.mubr.msk.bf16.vlgmr.msra.gmra.mxu0 %vm45_vm1, %v129_v3 }
  0xc9   :  { %v83_v5 = vpop.f32.mrf.mxu0 }
  0xca   :  { %v84_v6 = vadd.f32 %v105_v4, %v83_v5 }
  0xcb   :  { %v123_v7 = vpop.f32.mrf.mxu0 }
  0xcc   :  { %v112_v8 = vpack.c.bf16 %v84_v6, %v84_v6 }
  0xcd   :  { %v86_v9 = vpop.f32.mrf.mxu0 }
  0xce   :  { %99 = vst.msk [vmem:[%s173_s3] sm:$0xf] %vm98_vm2, %v112_v8  ;;  %v87_v10 = vadd.f32 %v105_v4, %v86_v9 }
  0xcf   :  { %v124_v11 = vpop.f32.mrf.mxu0 }
  0xd0   :  { %v113_v12 = vpack.c.bf16 %v87_v10, %v87_v10 }
  0xd2   :  { %100 = vst.msk [vmem:[%s173_s3 + $0x4] sm:$0xf] %vm98_vm2, %v113_v12 }

// kernel: informer_forward.18
= control target key start
LH: loop header
LB: loop body
LE: loop exit
PB: predicated region body
PF: predicated region fallthrough
CT: control target
= control target key end

     0   :  { %8 = vsyncpa [#allocation3], 0  ;;  %s598_s12 = smov 0   ;;  %s600_s13 = smov 0   ;;  %s682_s0 = inlined_call_operand.vmem [shape: bf16[2,4,8,8], index: 0, kind: input, shape index: {}]   ;;  %s683_s1 = inlined_call_operand.vmem [shape: bf16[2,4,8,8], index: 1, kind: input, shape index: {}]   ;;  %s684_s2 = inlined_call_operand.hbm [shape: f32[8,8], index: 2, kind: input, shape index: {}]   ;;  %s685_s3 = inlined_call_operand.vmem [shape: f32[2,4,8,1], index: 3, kind: output, shape index: {}]  }
   0x1   :  { %s602_s14 = smov 0   ;;  %s604_s15 = smov 0  }
   0x2   :  { %s606_s16 = smov 0  }
   0x3 LB: > { %s428_s17 = sadd.s32 4294967295, %s573_s16   ;;  %s23_s18 = sadd.s32 1, %s565_s14  ;;  %s573_s16 = sphi %s606_s16, %s14_s16   ;;  %s569_s15 = sphi %s604_s15, %s691_s15   ;;  %s565_s14 = sphi %s602_s14, %s690_s14   ;;  %s561_s13 = sphi %s600_s13, %s689_s13   ;;  %s557_s12 = sphi %s598_s12, %s688_s12  }
   0x4   : > { %p24_p0 = scmp.ge.s32.totalorder %s23_s18, 4  ;;  %s26_s19 = sadd.s32 1, %s569_s15 }
   0x5   : > { %p430_p1 = scmp.ge.s32.totalorder %s573_s16, 1  ;;  %p136_p2 = scmp.lt.s32.totalorder %s573_s16, 9 }
   0x6   : > { %s693_s18 = smov (%p24_p0, %s23_s18), 0  ;;  %s695_s19 = smov (!%p24_p0, %s26_s19), %s569_s15 }
   0x7   : > { %p631_p3 = pnand %p430_p1, %p136_p2  ;;  %p28_p4 = scmp.ge.s32.totalorder %s695_s19, 2 }
   0x8   : > { %p635_p5 = scmp.eq.s32.totalorder %s428_s17, 0  ;;  %s575_s22 = smov [#allocation2]  }
   0x9   : > { %p456_p6 = pneg %p631_p3  ;;  %s697_s19 = smov (%p28_p4, %s695_s19), 0 }
   0xa   : > { %s149_s23 = sshll.u32 %s575_s22, 4  ;;  %s150_s23 = int_to_ptr.vmem [resolvable:$true] %s149_s23 }
   0xb   : > { %p457_p7 = pnand %p635_p5, %p456_p6  ;;  %s516_s24 = scalar_lea.vmem %s150_s23, 128 }
   0xc   : > { %p517_p9 = scmp.ne.s32.totalorder %s150_s23, %s516_s24  ;;  %p524_p12 = scmp.lt.s32.totalorder %s150_s23, %s150_s23 }
   0xd   : > { %p507_p8 = pneg %p457_p7  ;;  %p525_p13 = scmp.lt.s32.totalorder %s516_s24, %s516_s24 }
   0xf   : > { %p519_p10 = pnand %p517_p9, %p507_p8  ;;  %p526_p0 = por %p525_p13, %p524_p12 }
  0x11   : > { %p520_p11 = pneg %p519_p10 }
  0x13   : > { %p527_p1 = pnand %p526_p0, %p520_p11 }
  0x15   : > { %530 = shalt.err (!%p527_p1)
}
  0x16   : > { %459 = dma.hbm_to_vmem [thread:$0]  (!%p457_p7), %s684_s2, 128, %s150_s23, [#allocation3]  }
  0x17   : > { %184 = sbr.rel (%p631_p3) target bundleno = 382 (0x17e), region = 32 }
  0x1c   : > { %552 = dma.done.wait (%p635_p5), [#allocation3], 128  }
  0x1d   : > { %554 = vsyncadd (%p635_p5), [#allocation3], 4294967168  ;;  %p222_p2 = scmp.lt.s32.totalorder %s561_s13, 1  ;;  %p224_p4 = scmp.lt.s32.totalorder %s557_s12, 3  ;;  %v576_v0 = vmov 0.0   ;;  %vm577_vm0 = vmmov 0  }
  0x1e   : > { %446 = vmatprep.subr.bf16.mxu0 %v576_v0  ;;  %448 = vmatprep.mubr.msk.bf16.mxu0 %vm577_vm0, %v576_v0  ;;  %vm254_vm1 = vcmask 1043456   ;;  %vm250_vm2 = vcmask 64512   ;;  %v249_v4 = vld [vmem:[#allocation2] sm:$0xff]  ;;  %vm309_vm4 = vcmask 7168  }
  0x1f   : > { %s699_s13 = smov (!%p222_p2, %s561_s13), 1  ;;  %s701_s12 = smov (!%p224_p4, %s557_s12), 3  ;;  %vm298_vm3 = vcmp.gt.f32.partialorder %v249_v4, 0.0 }
  0x20   : > { %s435_s27 = sshll.u32 %s699_s13, 2 }
  0x21   : > { %s227_s28 = sadd.s32 %s435_s27, %s701_s12 }
  0x22   : > { %s436_s29 = sshll.u32 %s227_s28, 2  ;;  %s440_s9 = sshll.u32 %s227_s28, 3 }
  0x23   : > { %s237_s5 = scalar_lea.vmem %s683_s1, %s436_s29  ;;  %s229_s8 = scalar_lea.vmem %s682_s0, %s436_s29 }
  0x24   : > { %v248_v1 = vld [vmem:[%s237_s5] sm:$0xf]  ;;  %s245_s12 = scalar_lea.vmem %s685_s3, %s440_s9 }
  0x25   : > { %v256_v2 = vsel %vm254_vm1, %v248_v1, 0  ;;  %v247_v3 = vld [vmem:[%s229_s8] sm:$0xf] }
  0x26   : > { %447 = vmatpush3.bf16.msra.mxu0 %v256_v2 }
  0x29   : > { %449 = vmatmul.mubr.msk.bf16.vlgmr.msra.gmra.mxu0 %vm250_vm2, %v247_v3 }
  0xe9   : > { %v292_v5 = vpop.f32.mrf.mxu0 }
  0xea   : > { %v303_v6 = vmul.f32 %v292_v5, %v249_v4  ;;  %v299_v10 = vsel %vm298_vm3, %v292_v5, -inf }
  0xeb   : > { %v450_v7 = vpop.f32.mrf.mxu0  ;;  %v300_v12 = vsel %vm250_vm2, %v299_v10, -inf }
  0xec   : > { %v304_v8 = vsel %vm250_vm2, %v303_v6, 0.0 }
  0xed   : > { %305 = vadd.xlane.f32.xlu0 %v304_v8  ;;  %v295_v9 = vpop.f32.mrf.mxu0 }
  0xef   : > { %v451_v11 = vpop.f32.mrf.mxu0 }
  0xf1   : > { %301 = vmax.xlane.f32.xlu0 %v300_v12 }
 0x176   : > { %v306_v13 = vpop.xlane.xlu0 %305 }
 0x177   : > { %v307_v14 = vmul.f32 0.125, %v306_v13 }
 0x17a   : > { %v302_v15 = vpop.xlane.xlu0 %301 }
 0x17b   : > { %v308_v16 = vsub.f32 %v302_v15, %v307_v14 }
 0x17d   : > { %310 = vst.msk [vmem:[%s245_s12] sm:$0xff] %vm309_vm4, %v308_v16 }
 0x17e PF: > { %s14_s16 = sadd.s32 1, %s573_s16   ;;  %s688_s12 = smov %s565_s14 }
 0x17f   : > { %p11_p3 = scmp.ge.s32.totalorder %s14_s16, 10   ;;  %s689_s13 = smov %s569_s15 }
 0x180   : > { %s690_s14 = smov %s693_s18  ;;  %s691_s15 = smov %s697_s19 }
 0x181   :  { %13 = sbr.rel (!%p11_p3) target bundleno = 3 (0x3), region = 70 }
 0x186   :  { %338 = vsyncpa [#allocation3], 1 }
 0x187   :  { %340 = vsyncpa [#allocation3 + $0x1], 1 }

// kernel: informer_forward.19
= control target key start
LH: loop header
LB: loop body
LE: loop exit
PB: predicated region body
PF: predicated region fallthrough
CT: control target
= control target key end

     0   :  { %s751_s15 = smov 0   ;;  %s753_s16 = smov 0   ;;  %s828_s0 = inlined_call_operand.vmem [shape: bf16[2,4,8,8], index: 0, kind: input, shape index: {}]   ;;  %s829_s1 = inlined_call_operand.vmem [shape: bf16[2,4,8,8], index: 1, kind: input, shape index: {}]   ;;  %s830_s2 = inlined_call_operand.vmem [shape: bf16[2,4,8,8], index: 2, kind: input, shape index: {}]   ;;  %s831_s3 = inlined_call_operand.vmem [shape: bf16[2,4,8,8], index: 3, kind: output, shape index: {0}]   ;;  %s832_s4 = inlined_call_operand.vmem [shape: bf16[2,4,1,8], index: 4, kind: output, shape index: {1}]  }
   0x1   :  { %s755_s17 = smov 0   ;;  %s757_s18 = smov 0  }
   0x2   :  { %s759_s19 = smov 0  }
   0x3 LB: > { %s24_s20 = sadd.s32 1, %s714_s17  ;;  %s27_s21 = sadd.s32 1, %s718_s18  ;;  %s722_s19 = sphi %s759_s19, %s15_s19   ;;  %s718_s18 = sphi %s757_s18, %s836_s18   ;;  %s714_s17 = sphi %s755_s17, %s835_s17   ;;  %s710_s16 = sphi %s753_s16, %s834_s16   ;;  %s706_s15 = sphi %s751_s15, %s833_s15  }
   0x4   : > { %p25_p0 = scmp.ge.s32.totalorder %s24_s20, 4  ;;  %p608_p1 = scmp.ge.s32.totalorder %s722_s19, 1 }
   0x5   : > { %p216_p2 = scmp.lt.s32.totalorder %s722_s19, 9 }
   0x6   : > { %s838_s20 = smov (%p25_p0, %s24_s20), 0  ;;  %s840_s21 = smov (!%p25_p0, %s27_s21), %s718_s18 }
   0x7   : > { %p217_p3 = pnand %p608_p1, %p216_p2  ;;  %p29_p4 = scmp.ge.s32.totalorder %s840_s21, 2 }
   0x8   : > { %p271_p5 = scmp.lt.s32.totalorder (!%p217_p3), %s710_s16, 1  ;;  %p273_p6 = scmp.lt.s32.totalorder (!%p217_p3), %s706_s15, 3 }
   0x9   : > { %s842_s21 = smov (%p29_p4, %s840_s21), 0  ;;  %220 = sbr.rel (%p217_p3) target bundleno = 732 (0x2dc), region = 32 }
   0xe   : > { %v724_v0 = vmov 0.0   ;;  %vm725_vm0 = vmmov 0   ;;  %s844_s16 = smov (!%p271_p5, %s710_s16), 1  ;;  %s846_s15 = smov (!%p273_p6, %s706_s15), 3  ;;  %vm318_vm1 = vcmask 1043456   ;;  %vm314_vm2 = vcmask 64512  }
   0xf   : > { %626 = vmatprep.subr.bf16.mxu0 %v724_v0  ;;  %628 = vmatprep.mubr.msk.bf16.mxu0 %vm725_vm0, %v724_v0  ;;  %s609_s22 = sshll.u32 %s844_s16, 2  ;;  %vm435_vm3 = vcmask 57344   ;;  %vm436_vm4 = vsmask.f32 256  ;;  %vm422_vm6 = vcmask 60416  }
  0x10   : > { %632 = vmatprep.subr.bf16.mxu1 %v724_v0  ;;  %634 = vmatprep.mubr.msk.bf16.mxu1 %vm725_vm0, %v724_v0  ;;  %s781_s23 = sadd.s32 %s609_s22, %s846_s15  ;;  %vm437_vm5 = vmand %vm435_vm3, %vm436_vm4 }
  0x11   : > { %s784_s24 = sshll.u32 %s781_s23, 2  ;;  %s309_s10 = scalar_lea.vmem %s832_s4, %s781_s23 }
  0x12   : > { %s286_s27 = scalar_lea.vmem %s829_s1, %s784_s24  ;;  %s278_s30 = scalar_lea.vmem %s828_s0, %s784_s24  ;;  %v438_v26 = vld [vmem:[%s309_s10] sm:$0x1] }
  0x13   : > { %v312_v1 = vld [vmem:[%s286_s27] sm:$0xf]  ;;  %s294_s7 = scalar_lea.vmem %s830_s2, %s784_s24  ;;  %s302_s13 = scalar_lea.vmem %s831_s3, %s784_s24 }
  0x14   : > { %v320_v2 = vsel %vm318_vm1, %v312_v1, 0  ;;  %v311_v3 = vld [vmem:[%s278_s30] sm:$0xf] }
  0x15   : > { %627 = vmatpush3.bf16.msra.mxu0 %v320_v2  ;;  %v313_v15 = vld [vmem:[%s294_s7] sm:$0xf] }
  0x16   : > { %v379_v16 = vsel %vm318_vm1, %v313_v15, 0  ;;  %v424_v17 = vunpack.c.l.bf16 %v313_v15 }
  0x17   : > { %633 = vmatpush3.bf16.msra.mxu1 %v379_v16 }
  0x18   : > { %629 = vmatmul.mubr.msk.bf16.vlgmr.msra.gmra.mxu0 %vm314_vm2, %v311_v3  ;;  %v425_v18 = vsel %vm314_vm2, %v424_v17, 0.0 }
  0x19   : > { %v426_v19 = vrot.slane %v425_v18, 4 }
  0x1b   : > { %v427_v20 = vadd.f32 %v426_v19, %v425_v18 }
  0x1d   : > { %v428_v21 = vrot.slane %v427_v20, 2 }
  0x1f   : > { %v429_v22 = vadd.f32 %v428_v21, %v427_v20 }
  0x21   : > { %v430_v23 = vrot.slane %v429_v22, 1 }
  0x23   : > { %v431_v24 = vadd.f32 %v430_v23, %v429_v22 }
  0x25   : > { %v433_v25 = vmul.f32 0.125, %v431_v24 }
  0x27   : > { %v434_v27 = vpack.c.bf16 %v433_v25, %v433_v25 }
  0x29   : > { %v439_v28 = vsel %vm437_vm5, %v434_v27, %v438_v26 }
  0x2a   : > { %440 = vst [vmem:[%s309_s10] sm:$0x1] %v439_v28 }
  0xd8   : > { %v356_v4 = vpop.f32.mrf.mxu0 }
  0xd9   : > { %v362_v5 = vmul.f32 0.35355338, %v356_v4 }
  0xda   : > { %v630_v6 = vpop.f32.mrf.mxu0 }
  0xdb   : > { %v363_v7 = vsel %vm314_vm2, %v362_v5, -inf }
  0xdc   : > { %364 = vmax.xlane.f32.xlu0 %v363_v7  ;;  %v359_v8 = vpop.f32.mrf.mxu0 }
  0xde   : > { %v631_v9 = vpop.f32.mrf.mxu0 }
 0x165   : > { %v365_v10 = vpop.xlane.xlu0 %364 }
 0x166   : > { %v366_v11 = vsub.f32 %v362_v5, %v365_v10 }
 0x168   : > { %v367_v12 = vmul.f32 1.442695, %v366_v11 }
 0x16a   : > { %680 = vpow2.f32 %v367_v12 }
 0x177   : > { %v681_v13 = vpop.eup %680 }
 0x178   : > { %v369_v14 = vsel %vm314_vm2, %v681_v13, 0.0 }
 0x179   : > { %370 = vadd.xlane.f32.xlu0 %v369_v14 }
 0x202   : > { %v371_v29 = vpop.xlane.xlu0 %370 }
 0x203   : > { %682 = vrcp.f32 %v371_v29 }
 0x210   : > { %v683_v30 = vpop.eup %682 }
 0x211   : > { %v373_v31 = vmul.f32 %v683_v30, %v681_v13 }
 0x213   : > { %v374_v32 = vpack.c.bf16 %v373_v31, %v373_v31 }
 0x215   : > { %635 = vmatmul.mubr.msk.bf16.vlgmr.msra.gmra.mxu1 %vm314_vm2, %v374_v32 }
 0x2d5   : > { %v415_v33 = vpop.f32.mrf.mxu1 }
 0x2d6   : > { %v421_v34 = vpack.c.bf16 %v415_v33, %v415_v33 }
 0x2d7   : > { %v636_v35 = vpop.f32.mrf.mxu1 }
 0x2d8   : > { %423 = vst.msk [vmem:[%s302_s13] sm:$0xf] %vm422_vm6, %v421_v34 }
 0x2d9   : > { %v418_v36 = vpop.f32.mrf.mxu1 }
 0x2db   : > { %v637_v37 = vpop.f32.mrf.mxu1 }
 0x2dc PF: > { %s15_s19 = sadd.s32 1, %s722_s19   ;;  %s833_s15 = smov %s714_s17 }
 0x2dd   : > { %p12_p7 = scmp.ge.s32.totalorder %s15_s19, 10   ;;  %s834_s16 = smov %s718_s18 }
 0x2de   : > { %s835_s17 = smov %s838_s20  ;;  %s836_s18 = smov %s842_s21 }
 0x2df   :  { %14 = sbr.rel (!%p12_p7) target bundleno = 3 (0x3), region = 80 }

// kernel: informer_forward.20
= control target key start
LH: loop header
LB: loop body
LE: loop exit
PB: predicated region body
PF: predicated region fallthrough
CT: control target
= control target key end

     0   :  { %v200_v0 = vmov 0.0   ;;  %vm201_vm0 = vmmov 0   ;;  %vm54_vm1 = vcmask 261120   ;;  %vm158_vm2 = vcmask 257024   ;;  %s269_s1 = inlined_call_operand.vmem [shape: bf16[32,32], index: 1, kind: input, shape index: {}]   ;;  %s270_s0 = inlined_call_operand.vmem [shape: bf16[16,32], index: 0, kind: input, shape index: {}]   ;;  %s271_s3 = inlined_call_operand.vmem [shape: bf16[16,32], index: 3, kind: input, shape index: {}]   ;;  %s272_s2 = inlined_call_operand.vmem [shape: f32[1,32], index: 2, kind: input, shape index: {}]   ;;  %s273_s4 = inlined_call_operand.vmem [shape: f32[1,32], index: 4, kind: input, shape index: {}]   ;;  %s274_s5 = inlined_call_operand.vmem [shape: f32[1,32], index: 5, kind: input, shape index: {}]   ;;  %s275_s6 = inlined_call_operand.vmem [shape: bf16[16,32], index: 6, kind: output, shape index: {}]  }
   0x1   :  { %183 = vmatprep.subr.bf16.mxu0 %v200_v0  ;;  %v193_v1 = vld [vmem:[%s269_s1 + $0x8] sm:$0xff]   ;;  %187 = vmatprep.mubr.msk.bf16.mxu0 %vm201_vm0, %v200_v0  ;;  %v194_v2 = vld [vmem:[%s269_s1] sm:$0xff]  }
   0x2   :  { %184 = vmatpush3.bf16.msra.mxu0 %v193_v1  ;;  %v195_v3 = vld [vmem:[%s270_s0] sm:$0xff]  }
   0x3   :  { %185 = vmatprep.subr.bf16.mxu0 %v200_v0  ;;  %v177_v4 = vld [vmem:[%s271_s3] sm:$0xff]  }
   0x4   :  { %v165_v5 = vld [vmem:[%s272_s2] ss:$0 sm:$0xff]  ;;  %v178_v6 = vunpack.c.l.bf16 %v177_v4  ;;  %v179_v11 = vunpack.c.h.bf16 %v177_v4 }
   0x5   :  { %v170_v35 = vld [vmem:[%s273_s4] ss:$0 sm:$0xff] }
   0x6   :  { %186 = vmatpush3.bf16.msra.mxu0 %v194_v2  ;;  %v171_v37 = vld [vmem:[%s274_s5] ss:$0 sm:$0xff] }
   0x9   :  { %188 = vmatmul.mubr.msk.bf16.vlgmr.msra.gmra.mxu0 %vm54_vm1, %v195_v3 }
  0xc9   :  { %v92_v7 = vpop.f32.mrf.mxu0 }
  0xca   :  { %v93_v8 = vadd.f32 %v165_v5, %v92_v7 }
  0xcb   :  { %v189_v9 = vpop.f32.mrf.mxu0 }
  0xcc   :  { %v103_v10 = vadd.f32 %v178_v6, %v93_v8 }
  0xcd   :  { %v95_v12 = vpop.f32.mrf.mxu0 }
  0xce   :  { %v96_v13 = vadd.f32 %v165_v5, %v95_v12  ;;  %v107_v14 = vsel %vm54_vm1, %v103_v10, 0.0 }
  0xcf   :  { %108 = vadd.xlane.f32.xlu0 %v107_v14  ;;  %v190_v15 = vpop.f32.mrf.mxu0 }
  0xd0   :  { %v104_v16 = vadd.f32 %v179_v11, %v96_v13 }
  0xd2   :  { %v110_v17 = vsel %vm54_vm1, %v104_v16, 0.0 }
  0xd3   :  { %111 = vadd.xlane.f32.xlu0 %v110_v17 }
 0x158   :  { %v109_v18 = vpop.xlane.xlu0 %108 }
 0x159   :  { %v114_v19 = vmul.f32 0.03125, %v109_v18 }
 0x15b   :  { %v116_v20 = vsub.f32 %v103_v10, %v114_v19 }
 0x15c   :  { %v112_v21 = vpop.xlane.xlu0 %111 }
 0x15d   :  { %v115_v22 = vmul.f32 0.03125, %v112_v21  ;;  %v118_v23 = vmul.f32 %v116_v20, %v116_v20 }
 0x15f   :  { %v117_v24 = vsub.f32 %v104_v16, %v115_v22  ;;  %v120_v25 = vsel %vm54_vm1, %v118_v23, 0.0 }
 0x160   :  { %121 = vadd.xlane.f32.xlu1 %v120_v25 }
 0x161   :  { %v119_v26 = vmul.f32 %v117_v24, %v117_v24 }
 0x163   :  { %v123_v27 = vsel %vm54_vm1, %v119_v26, 0.0 }
 0x164   :  { %124 = vadd.xlane.f32.xlu1 %v123_v27 }
 0x1e9   :  { %v122_v28 = vpop.xlane.xlu1 %121 }
 0x1ea   :  { %v126_v29 = vmul.f32 0.03125, %v122_v28 }
 0x1ec   :  { %v128_v30 = vadd.f32 1e-05, %v126_v29 }
 0x1ed   :  { %v125_v31 = vpop.xlane.xlu1 %124 }
 0x1ee   :  { %196 = vrsqrt.f32 %v128_v30  ;;  %v127_v32 = vmul.f32 0.03125, %v125_v31 }
 0x1f0   :  { %v129_v33 = vadd.f32 1e-05, %v127_v32 }
 0x1f2   :  { %198 = vrsqrt.f32 %v129_v33 }
 0x1fb   :  { %v197_v34 = vpop.eup %196 }
 0x1fc   :  { %v132_v36 = vmul.f32 %v197_v34, %v116_v20 }
 0x1fe   :  { %v140_v38 = vmul.f32 %v170_v35, %v132_v36 }
 0x1ff   :  { %v199_v39 = vpop.eup %198 }
 0x200   :  { %v148_v40 = vadd.f32 %v171_v37, %v140_v38  ;;  %v133_v41 = vmul.f32 %v199_v39, %v117_v24 }
 0x202   :  { %v174_v42 = vpack.c.bf16 %v148_v40, %v148_v40  ;;  %v141_v43 = vmul.f32 %v170_v35, %v133_v41 }
 0x204   :  { %159 = vst.msk [vmem:[%s275_s6] sm:$0xf] %vm158_vm2, %v174_v42  ;;  %v149_v44 = vadd.f32 %v171_v37, %v141_v43 }
 0x206   :  { %v175_v45 = vpack.c.bf16 %v149_v44, %v149_v44 }
 0x208   :  { %160 = vst.msk [vmem:[%s275_s6 + $0x4] sm:$0xf] %vm158_vm2, %v175_v45 }

// kernel: informer_forward.21
= control target key start
LH: loop header
LB: loop body
LE: loop exit
PB: predicated region body
PF: predicated region fallthrough
CT: control target
= control target key end

     0   :  { %v193_v0 = vmov 0.0   ;;  %vm194_vm0 = vmmov 0   ;;  %vm45_vm1 = vcmask 261120   ;;  %v195_v49 = vmov -1.0   ;;  %s234_s1 = inlined_call_operand.vmem [shape: bf16[32,64], index: 1, kind: input, shape index: {}]   ;;  %s235_s0 = inlined_call_operand.vmem [shape: bf16[16,32], index: 0, kind: input, shape index: {}]   ;;  %s236_s2 = inlined_call_operand.vmem [shape: f32[1,64], index: 2, kind: input, shape index: {}]   ;;  %s237_s3 = inlined_call_operand.vmem [shape: bf16[16,64], index: 3, kind: output, shape index: {}]  }
   0x1   :  { %171 = vmatprep.subr.bf16.mxu0 %v193_v0  ;;  %v182_v1 = vld [vmem:[%s234_s1 + $0x8] sm:$0xff]   ;;  %175 = vmatprep.mubr.msk.bf16.mxu0 %vm194_vm0, %v193_v0  ;;  %v183_v2 = vld [vmem:[%s234_s1] sm:$0xff]   ;;  %vm152_vm4 = vcmask 519168  }
   0x2   :  { %172 = vmatpush3.bf16.msra.mxu0 %v182_v1  ;;  %v184_v3 = vld [vmem:[%s235_s0] sm:$0xff]  }
   0x3   :  { %173 = vmatprep.subr.bf16.mxu0 %v193_v0  ;;  %v159_v4 = vld [vmem:[%s236_s2] ss:$0 sm:$0xff] }
   0x6   :  { %174 = vmatpush3.bf16.msra.mxu0 %v183_v2 }
   0x9   :  { %176 = vmatmul.mubr.msk.bf16.vlgmr.msra.gmra.mxu0 %vm45_vm1, %v184_v3 }
  0xc9   :  { %v83_v5 = vpop.f32.mrf.mxu0 }
  0xca   :  { %v84_v6 = vadd.f32 %v159_v4, %v83_v5 }
  0xcb   :  { %v177_v7 = vpop.f32.mrf.mxu0 }
  0xcc   :  { %v92_v8 = vmul.f32 0.70710677, %v84_v6  ;;  %v90_v53 = vmul.f32 0.5, %v84_v6 }
  0xcd   :  { %v86_v9 = vpop.f32.mrf.mxu0 }
  0xce   :  { %v98_v10 = vand.u32 2147483647, %v92_v8  ;;  %v87_v11 = vadd.f32 %v159_v4, %v86_v9  ;;  %vm94_vm2 = vcmp.ge.f32.partialorder %v92_v8, 0.0 }
  0xcf   :  { %v178_v12 = vpop.f32.mrf.mxu0  ;;  %v96_v50 = vsel %vm94_vm2, 1.0, %v195_v49 }
  0xd0   :  { %v100_v13 = vmul.f32 0.3275911, %v98_v10  ;;  %v93_v14 = vmul.f32 0.70710677, %v87_v11  ;;  %v126_v19 = vsub.f32 0.0, %v98_v10  ;;  %v91_v60 = vmul.f32 0.5, %v87_v11 }
  0xd2   :  { %v102_v15 = vadd.f32 1.0, %v100_v13  ;;  %v99_v16 = vand.u32 2147483647, %v93_v14  ;;  %v128_v20 = vmul.f32 %v126_v19, %v98_v10  ;;  %vm95_vm3 = vcmp.ge.f32.partialorder %v93_v14, 0.0 }
  0xd3   :  { %v97_v56 = vsel %vm95_vm3, 1.0, %v195_v49 }
  0xd4   :  { %185 = vrcp.f32 %v102_v15  ;;  %v101_v17 = vmul.f32 0.3275911, %v99_v16  ;;  %v127_v21 = vsub.f32 0.0, %v99_v16  ;;  %v130_v24 = vmul.f32 1.442695, %v128_v20 }
  0xd6   :  { %v103_v18 = vadd.f32 1.0, %v101_v17  ;;  %v129_v25 = vmul.f32 %v127_v21, %v99_v16 }
  0xd8   :  { %187 = vrcp.f32 %v103_v18  ;;  %v132_v30 = vmul.f32 1.442695, %v129_v25 }
  0xd9   :  { %189 = vpow2.f32 %v130_v24 }
  0xda   :  { %191 = vpow2.f32 %v132_v30 }
  0xe1   :  { %v186_v22 = vpop.eup %185 }
  0xe2   :  { %v108_v23 = vmul.f32 1.0614054, %v186_v22 }
  0xe4   :  { %v110_v26 = vadd.f32 -1.4531521, %v108_v23 }
  0xe5   :  { %v188_v27 = vpop.eup %187 }
  0xe6   :  { %v112_v28 = vmul.f32 %v186_v22, %v110_v26  ;;  %v109_v29 = vmul.f32 1.0614054, %v188_v27  ;;  %v190_v43 = vpop.eup %189 }
  0xe7   :  { %v192_v48 = vpop.eup %191 }
  0xe8   :  { %v114_v31 = vadd.f32 1.4214138, %v112_v28  ;;  %v111_v32 = vadd.f32 -1.4531521, %v109_v29 }
  0xea   :  { %v116_v33 = vmul.f32 %v186_v22, %v114_v31  ;;  %v113_v34 = vmul.f32 %v188_v27, %v111_v32 }
  0xec   :  { %v118_v35 = vadd.f32 -0.28449672, %v116_v33  ;;  %v115_v36 = vadd.f32 1.4214138, %v113_v34 }
  0xee   :  { %v120_v37 = vmul.f32 %v186_v22, %v118_v35  ;;  %v117_v38 = vmul.f32 %v188_v27, %v115_v36 }
  0xf0   :  { %v122_v39 = vadd.f32 0.2548296, %v120_v37  ;;  %v119_v40 = vadd.f32 -0.28449672, %v117_v38 }
  0xf2   :  { %v124_v41 = vmul.f32 %v186_v22, %v122_v39  ;;  %v121_v42 = vmul.f32 %v188_v27, %v119_v40 }
  0xf4   :  { %v134_v44 = vmul.f32 %v190_v43, %v124_v41  ;;  %v123_v45 = vadd.f32 0.2548296, %v121_v42 }
  0xf6   :  { %v136_v46 = vsub.f32 1.0, %v134_v44  ;;  %v125_v47 = vmul.f32 %v188_v27, %v123_v45 }
  0xf8   :  { %v138_v51 = vmul.f32 %v136_v46, %v96_v50  ;;  %v135_v52 = vmul.f32 %v192_v48, %v125_v47 }
  0xfa   :  { %v140_v54 = vadd.f32 1.0, %v138_v51  ;;  %v137_v55 = vsub.f32 1.0, %v135_v52 }
  0xfc   :  { %v142_v57 = vmul.f32 %v140_v54, %v90_v53  ;;  %v139_v58 = vmul.f32 %v137_v55, %v97_v56 }
  0xfe   :  { %v166_v59 = vpack.c.bf16 %v142_v57, %v142_v57  ;;  %v141_v61 = vadd.f32 1.0, %v139_v58 }
 0x100   :  { %153 = vst.msk [vmem:[%s237_s3] sm:$0xf] %vm152_vm4, %v166_v59  ;;  %v143_v62 = vmul.f32 %v141_v61, %v91_v60 }
 0x102   :  { %v167_v63 = vpack.c.bf16 %v143_v62, %v143_v62 }
 0x104   :  { %154 = vst.msk [vmem:[%s237_s3 + $0x4] sm:$0xf] %vm152_vm4, %v167_v63 }

// kernel: informer_forward.22
= control target key start
LH: loop header
LB: loop body
LE: loop exit
PB: predicated region body
PF: predicated region fallthrough
CT: control target
= control target key end

     0   :  { %v227_v0 = vmov 0.0   ;;  %vm228_vm0 = vmmov 0   ;;  %vm70_vm1 = vcmask 523264   ;;  %vm123_vm2 = vcmask 261120   ;;  %s301_s1 = inlined_call_operand.vmem [shape: bf16[64,32], index: 1, kind: input, shape index: {}]   ;;  %s302_s0 = inlined_call_operand.vmem [shape: bf16[16,64], index: 0, kind: input, shape index: {}]   ;;  %s303_s3 = inlined_call_operand.vmem [shape: bf16[16,32], index: 3, kind: input, shape index: {}]   ;;  %s304_s2 = inlined_call_operand.vmem [shape: f32[1,32], index: 2, kind: input, shape index: {}]   ;;  %s305_s4 = inlined_call_operand.vmem [shape: f32[1,32], index: 4, kind: input, shape index: {}]   ;;  %s306_s5 = inlined_call_operand.vmem [shape: f32[1,32], index: 5, kind: input, shape index: {}]   ;;  %s307_s6 = inlined_call_operand.vmem [shape: bf16[16,32], index: 6, kind: output, shape index: {}]  }
   0x1   :  { %204 = vmatprep.subr.bf16.mxu0 %v227_v0  ;;  %v218_v1 = vld [vmem:[%s301_s1 + $0x18] sm:$0xff]   ;;  %212 = vmatprep.mubr.msk.bf16.mxu0 %vm228_vm0, %v227_v0  ;;  %v219_v2 = vld [vmem:[%s301_s1 + $0x10] sm:$0xff]   ;;  %v220_v3 = vld [vmem:[%s301_s1 + $0x8] sm:$0xff]   ;;  %vm175_vm3 = vcmask 257024  }
   0x2   :  { %205 = vmatpush3.bf16.msra.mxu0 %v218_v1  ;;  %v221_v4 = vld [vmem:[%s301_s1] sm:$0xff]  }
   0x3   :  { %206 = vmatprep.subr.bf16.mxu0 %v227_v0  ;;  %v222_v5 = vld [vmem:[%s302_s0] sm:$0xff]  }
   0x4   :  { %v196_v6 = vld [vmem:[%s303_s3] sm:$0xff]  }
   0x5   :  { %v182_v7 = vld [vmem:[%s304_s2] ss:$0 sm:$0xff]  ;;  %v197_v8 = vunpack.c.l.bf16 %v196_v6  ;;  %v198_v13 = vunpack.c.h.bf16 %v196_v6 }
   0x6   :  { %207 = vmatpush3.bf16.msra.mxu0 %v219_v2  ;;  %v189_v37 = vld [vmem:[%s305_s4] ss:$0 sm:$0xff] }
   0x7   :  { %208 = vmatprep.subr.bf16.mxu0 %v227_v0  ;;  %v190_v39 = vld [vmem:[%s306_s5] ss:$0 sm:$0xff] }
   0xa   :  { %209 = vmatpush3.bf16.msra.mxu0 %v220_v3 }
   0xb   :  { %210 = vmatprep.subr.bf16.mxu0 %v227_v0 }
   0xe   :  { %211 = vmatpush3.bf16.msra.mxu0 %v221_v4 }
  0x11   :  { %213 = vmatmul.mubr.msk.bf16.vlgmr.msra.gmra.mxu0 %vm70_vm1, %v222_v5 }
  0xd1   :  { %v108_v9 = vpop.f32.mrf.mxu0 }
  0xd2   :  { %v109_v10 = vadd.f32 %v182_v7, %v108_v9 }
  0xd3   :  { %v214_v11 = vpop.f32.mrf.mxu0 }
  0xd4   :  { %v119_v12 = vadd.f32 %v197_v8, %v109_v10 }
  0xd5   :  { %v111_v14 = vpop.f32.mrf.mxu0 }
  0xd6   :  { %v112_v15 = vadd.f32 %v182_v7, %v111_v14  ;;  %v124_v16 = vsel %vm123_vm2, %v119_v12, 0.0 }
  0xd7   :  { %125 = vadd.xlane.f32.xlu0 %v124_v16  ;;  %v215_v17 = vpop.f32.mrf.mxu0 }
  0xd8   :  { %v120_v18 = vadd.f32 %v198_v13, %v112_v15 }
  0xda   :  { %v127_v19 = vsel %vm123_vm2, %v120_v18, 0.0 }
  0xdb   :  { %128 = vadd.xlane.f32.xlu0 %v127_v19 }
 0x160   :  { %v126_v20 = vpop.xlane.xlu0 %125 }
 0x161   :  { %v131_v21 = vmul.f32 0.03125, %v126_v20 }
 0x163   :  { %v133_v22 = vsub.f32 %v119_v12, %v131_v21 }
 0x164   :  { %v129_v23 = vpop.xlane.xlu0 %128 }
 0x165   :  { %v132_v24 = vmul.f32 0.03125, %v129_v23  ;;  %v135_v25 = vmul.f32 %v133_v22, %v133_v22 }
 0x167   :  { %v134_v26 = vsub.f32 %v120_v18, %v132_v24  ;;  %v137_v27 = vsel %vm123_vm2, %v135_v25, 0.0 }
 0x168   :  { %138 = vadd.xlane.f32.xlu1 %v137_v27 }
 0x169   :  { %v136_v28 = vmul.f32 %v134_v26, %v134_v26 }
 0x16b   :  { %v140_v29 = vsel %vm123_vm2, %v136_v28, 0.0 }
 0x16c   :  { %141 = vadd.xlane.f32.xlu1 %v140_v29 }
 0x1f1   :  { %v139_v30 = vpop.xlane.xlu1 %138 }
 0x1f2   :  { %v143_v31 = vmul.f32 0.03125, %v139_v30 }
 0x1f4   :  { %v145_v32 = vadd.f32 1e-05, %v143_v31 }
 0x1f5   :  { %v142_v33 = vpop.xlane.xlu1 %141 }
 0x1f6   :  { %223 = vrsqrt.f32 %v145_v32  ;;  %v144_v34 = vmul.f32 0.03125, %v142_v33 }
 0x1f8   :  { %v146_v35 = vadd.f32 1e-05, %v144_v34 }
 0x1fa   :  { %225 = vrsqrt.f32 %v146_v35 }
 0x203   :  { %v224_v36 = vpop.eup %223 }
 0x204   :  { %v149_v38 = vmul.f32 %v224_v36, %v133_v22 }
 0x206   :  { %v157_v40 = vmul.f32 %v189_v37, %v149_v38 }
 0x207   :  { %v226_v41 = vpop.eup %225 }
 0x208   :  { %v165_v42 = vadd.f32 %v190_v39, %v157_v40  ;;  %v150_v43 = vmul.f32 %v226_v41, %v134_v26 }
 0x20a   :  { %v193_v44 = vpack.c.bf16 %v165_v42, %v165_v42  ;;  %v158_v45 = vmul.f32 %v189_v37, %v150_v43 }
 0x20c   :  { %176 = vst.msk [vmem:[%s307_s6] sm:$0xf] %vm175_vm3, %v193_v44  ;;  %v166_v46 = vadd.f32 %v190_v39, %v158_v45 }
 0x20e   :  { %v194_v47 = vpack.c.bf16 %v166_v46, %v166_v46 }
 0x210   :  { %177 = vst.msk [vmem:[%s307_s6 + $0x4] sm:$0xf] %vm175_vm3, %v194_v47 }

// kernel: informer_forward.29
= control target key start
LH: loop header
LB: loop body
LE: loop exit
PB: predicated region body
PF: predicated region fallthrough
CT: control target
= control target key end

     0   :  { %vm23_vm0 = vcmask 261120   ;;  %v176_v5 = vmov 0   ;;  %vm143_vm3 = vcmask 257024   ;;  %s228_s0 = inlined_call_operand.vmem [shape: bf16[16,32], index: 0, kind: input, shape index: {}]   ;;  %s229_s3 = inlined_call_operand.vmem [shape: f32[16,1], index: 3, kind: input, shape index: {}]   ;;  %s230_s1 = inlined_call_operand.vmem [shape: f32[1,32], index: 1, kind: input, shape index: {}]   ;;  %s231_s2 = inlined_call_operand.vmem [shape: f32[1,32], index: 2, kind: input, shape index: {}]   ;;  %s232_s4 = inlined_call_operand.vmem [shape: bf16[16,32], index: 4, kind: output, shape index: {}]  }
   0x1   :  { %v157_v0 = vld [vmem:[%s228_s0] sm:$0xff]   ;;  %162 = vset.pattern.permute.xlu0 %v176_v5  ;;  %163 = vset.pattern.permute.xlu1 %v176_v5  ;;  %v122_v17 = vld [vmem:[%s229_s3 + $0x8] sm:$0xff] }
   0x2   :  { %v158_v1 = vunpack.c.l.bf16 %v157_v0  ;;  %v159_v2 = vunpack.c.h.bf16 %v157_v0  ;;  %v121_v6 = vld [vmem:[%s229_s3] sm:$0xff] }
   0x3   :  { %v150_v25 = vld [vmem:[%s230_s1] ss:$0 sm:$0xff] }
   0x4   :  { %v24_v3 = vsel %vm23_vm0, %v158_v1, 0.0  ;;  %v27_v4 = vsel %vm23_vm0, %v159_v2, 0.0  ;;  %v151_v27 = vld [vmem:[%s231_s2] ss:$0 sm:$0xff] }
   0x5   :  { %25 = vadd.xlane.f32.xlu0 %v24_v3 }
   0x9   :  { %28 = vadd.xlane.f32.xlu0 %v27_v4 }
  0x1f   :  { %125 = vperm.xlu0 %162, %v121_v6  }
  0x8e   :  { %v26_v7 = vpop.xlane.xlu0 %25 }
  0x8f   :  { %v31_v8 = vmul.f32 0.03125, %v26_v7 }
  0x91   :  { %v33_v9 = vsub.f32 %v158_v1, %v31_v8  ;;  %v177_v8 = vmov -1.0  }
  0x92   :  { %v29_v10 = vpop.xlane.xlu0 %28 }
  0x93   :  { %v32_v11 = vmul.f32 0.03125, %v29_v10  ;;  %v35_v12 = vmul.f32 %v33_v9, %v33_v9 }
  0x95   :  { %v34_v13 = vsub.f32 %v159_v2, %v32_v11  ;;  %v37_v14 = vsel %vm23_vm0, %v35_v12, 0.0 }
  0x96   :  { %38 = vadd.xlane.f32.xlu1 %v37_v14 }
  0x97   :  { %v36_v15 = vmul.f32 %v34_v13, %v34_v13 }
  0x99   :  { %v40_v16 = vsel %vm23_vm0, %v36_v15, 0.0 }
  0x9a   :  { %41 = vadd.xlane.f32.xlu1 %v40_v16  ;;  %v126_v15 = vpop.permute.xlu0 %125 }
  0xab   :  { %130 = vperm.xlu1 %163, %v122_v17  }
 0x11f   :  { %v39_v18 = vpop.xlane.xlu1 %38 }
 0x120   :  { %v43_v19 = vmul.f32 0.03125, %v39_v18 }
 0x122   :  { %v45_v20 = vadd.f32 1e-05, %v43_v19 }
 0x123   :  { %v42_v21 = vpop.xlane.xlu1 %41 }
 0x124   :  { %164 = vrsqrt.f32 %v45_v20  ;;  %v44_v22 = vmul.f32 0.03125, %v42_v21 }
 0x126   :  { %v46_v23 = vadd.f32 1e-05, %v44_v22 }
 0x127   :  { %v131_v22 = vpop.permute.xlu1 %130 }
 0x128   :  { %166 = vrsqrt.f32 %v46_v23 }
 0x131   :  { %v165_v24 = vpop.eup %164 }
 0x132   :  { %v49_v26 = vmul.f32 %v165_v24, %v33_v9 }
 0x134   :  { %v57_v28 = vmul.f32 %v150_v25, %v49_v26 }
 0x135   :  { %v167_v29 = vpop.eup %166 }
 0x136   :  { %v65_v30 = vadd.f32 %v151_v27, %v57_v28  ;;  %v50_v31 = vmul.f32 %v167_v29, %v34_v13 }
 0x138   :  { %v69_v32 = vmul.f32 0.70710677, %v65_v30  ;;  %v58_v33 = vmul.f32 %v150_v25, %v50_v31  ;;  %v67_v12 = vmul.f32 0.5, %v65_v30 }
 0x13a   :  { %v75_v34 = vand.u32 2147483647, %v69_v32  ;;  %v66_v35 = vadd.f32 %v151_v27, %v58_v33  ;;  %vm71_vm1 = vcmp.ge.f32.partialorder %v69_v32, 0.0 }
 0x13b   :  { %v73_v9 = vsel %vm71_vm1, 1.0, %v177_v8 }
 0x13c   :  { %v77_v36 = vmul.f32 0.3275911, %v75_v34  ;;  %v70_v37 = vmul.f32 0.70710677, %v66_v35  ;;  %v103_v42 = vsub.f32 0.0, %v75_v34  ;;  %v68_v20 = vmul.f32 0.5, %v66_v35 }
 0x13e   :  { %v79_v38 = vadd.f32 1.0, %v77_v36  ;;  %v76_v39 = vand.u32 2147483647, %v70_v37  ;;  %v105_v43 = vmul.f32 %v103_v42, %v75_v34  ;;  %vm72_vm2 = vcmp.ge.f32.partialorder %v70_v37, 0.0 }
 0x13f   :  { %v74_v16 = vsel %vm72_vm2, 1.0, %v177_v8 }
 0x140   :  { %168 = vrcp.f32 %v79_v38  ;;  %v78_v40 = vmul.f32 0.3275911, %v76_v39  ;;  %v104_v44 = vsub.f32 0.0, %v76_v39  ;;  %v107_v47 = vmul.f32 1.442695, %v105_v43 }
 0x142   :  { %v80_v41 = vadd.f32 1.0, %v78_v40  ;;  %v106_v48 = vmul.f32 %v104_v44, %v76_v39 }
 0x144   :  { %170 = vrcp.f32 %v80_v41  ;;  %v109_v53 = vmul.f32 1.442695, %v106_v48 }
 0x145   :  { %172 = vpow2.f32 %v107_v47 }
 0x146   :  { %174 = vpow2.f32 %v109_v53 }
 0x14d   :  { %v169_v45 = vpop.eup %168 }
 0x14e   :  { %v85_v46 = vmul.f32 1.0614054, %v169_v45 }
 0x150   :  { %v87_v49 = vadd.f32 -1.4531521, %v85_v46 }
 0x151   :  { %v171_v50 = vpop.eup %170 }
 0x152   :  { %v89_v51 = vmul.f32 %v169_v45, %v87_v49  ;;  %v86_v52 = vmul.f32 1.0614054, %v171_v50  ;;  %v173_v2 = vpop.eup %172 }
 0x153   :  { %v175_v7 = vpop.eup %174 }
 0x154   :  { %v91_v54 = vadd.f32 1.4214138, %v89_v51  ;;  %v88_v55 = vadd.f32 -1.4531521, %v86_v52 }
 0x156   :  { %v93_v56 = vmul.f32 %v169_v45, %v91_v54  ;;  %v90_v57 = vmul.f32 %v171_v50, %v88_v55 }
 0x158   :  { %v95_v58 = vadd.f32 -0.28449672, %v93_v56  ;;  %v92_v59 = vadd.f32 1.4214138, %v90_v57 }
 0x15a   :  { %v97_v60 = vmul.f32 %v169_v45, %v95_v58  ;;  %v94_v61 = vmul.f32 %v171_v50, %v92_v59 }
 0x15c   :  { %v99_v62 = vadd.f32 0.2548296, %v97_v60  ;;  %v96_v63 = vadd.f32 -0.28449672, %v94_v61 }
 0x15e   :  { %v101_v0 = vmul.f32 %v169_v45, %v99_v62  ;;  %v98_v1 = vmul.f32 %v171_v50, %v96_v63 }
 0x160   :  { %v111_v3 = vmul.f32 %v173_v2, %v101_v0  ;;  %v100_v4 = vadd.f32 0.2548296, %v98_v1 }
 0x162   :  { %v113_v5 = vsub.f32 1.0, %v111_v3  ;;  %v102_v6 = vmul.f32 %v171_v50, %v100_v4 }
 0x164   :  { %v115_v10 = vmul.f32 %v113_v5, %v73_v9  ;;  %v112_v11 = vmul.f32 %v175_v7, %v102_v6 }
 0x166   :  { %v117_v13 = vadd.f32 1.0, %v115_v10  ;;  %v114_v14 = vsub.f32 1.0, %v112_v11 }
 0x168   :  { %v119_v17 = vmul.f32 %v117_v13, %v67_v12  ;;  %v116_v18 = vmul.f32 %v114_v14, %v74_v16 }
 0x16a   :  { %v133_v19 = vmul.f32 %v126_v15, %v119_v17  ;;  %v118_v21 = vadd.f32 1.0, %v116_v18 }
 0x16c   :  { %v154_v23 = vpack.c.bf16 %v133_v19, %v133_v19  ;;  %v120_v24 = vmul.f32 %v118_v21, %v68_v20 }
 0x16e   :  { %144 = vst.msk [vmem:[%s232_s4] sm:$0xf] %vm143_vm3, %v154_v23  ;;  %v134_v25 = vmul.f32 %v131_v22, %v120_v24 }
 0x170   :  { %v155_v26 = vpack.c.bf16 %v134_v25, %v134_v25 }
 0x172   :  { %145 = vst.msk [vmem:[%s232_s4 + $0x4] sm:$0xf] %vm143_vm3, %v155_v26 }

</bundles_post_ra>
